<compile_context>
chip_gen: v7x
topology: tpu7x:2x2x1
jax: 0.10.0
libtpu: 0.0.40
codegen_flags: <defaults>
</compile_context>

<pallas_src>
import jax
import jax.numpy as jnp
import numpy as np
from jax.experimental import pallas as pl
from jax.experimental.pallas import tpu as pltpu


# ----------------------------- Pallas kernel --------------------------------
def cbam_kernel(x_ref, w1_ref, w2_ref, amat_ref, shift_ref, o_ref):
    # x_ref:    (B, C, HW) VMEM f32 -- whole batch, spatial dims flattened (lane-dense)
    # w1_ref:   (hidden, C) VMEM    -- fc1 weight (PyTorch layout, no bias)
    # w2_ref:   (C, hidden) VMEM    -- fc2 weight (PyTorch layout, no bias)
    # amat_ref: (2*HW, HW) VMEM bf16-- 7x7 conv as dense matrix (BN scale folded);
    #                                  rows [0:HW) = max channel, [HW:2HW) = mean channel
    # shift_ref:(1,) SMEM f32       -- folded BatchNorm shift (eval mode)
    # o_ref:    (B, C, HW) VMEM     -- output
    B, C, HW = x_ref.shape
    inv_hw = jnp.float32(1.0 / HW)
    inv_c = jnp.float32(1.0 / C)

    # ---------------- channel attention: global avg/max pool over HW --------------
    # Pre-reduce the two 128-lane halves on the VPU before the cross-lane (XLU) reduce.
    avg_cols, max_cols = [], []
    for b in range(B):                                   # static, unrolled at trace time
        xb = x_ref[b].astype(jnp.float32)                # (C, HW)
        if HW % 256 == 0:
            half = HW // 2
            lo, hi = xb[:, :half], xb[:, half:]
            s_pre, m_pre = lo + hi, jnp.maximum(lo, hi)
        else:
            s_pre = m_pre = xb
        avg_cols.append(jnp.sum(s_pre, axis=1, keepdims=True) * inv_hw)   # (C, 1)
        max_cols.append(jnp.max(m_pre, axis=1, keepdims=True))            # (C, 1)

    # Fused shared-MLP across batch AND pool type: one matmul pair instead of 2B pairs.
    pooled = jnp.concatenate(avg_cols + max_cols, axis=1)                 # (C, 2B)
    h = jnp.maximum(
        jnp.dot(w1_ref[...], pooled, preferred_element_type=jnp.float32), 0.0)  # (hid, 2B)
    o2 = jnp.dot(w2_ref[...], h, preferred_element_type=jnp.float32)            # (C, 2B)
    ca = jax.nn.sigmoid(o2[:, :B] + o2[:, B:])                                   # (C, B)

    # ---------------- spatial attention: channel pools + conv-as-matmul -----------
    rows = []
    for b in range(B):
        xb = x_ref[b].astype(jnp.float32)
        x1b = xb * ca[:, b:b + 1]                        # (C, HW) channel re-scale
        if C % 16 == 0:
            hc = C // 2                                  # pre-reduce sublane halves (VPU)
            lo, hi = x1b[:hc, :], x1b[hc:, :]
            s_pre, m_pre = lo + hi, jnp.maximum(lo, hi)
        else:
            s_pre = m_pre = x1b
        ch_max = jnp.max(m_pre, axis=0, keepdims=True)            # (1, HW)
        ch_mean = jnp.sum(s_pre, axis=0, keepdims=True) * inv_c   # (1, HW)
        rows.append(jnp.concatenate([ch_max, ch_mean], axis=1))   # (1, 2*HW)
    cm = jnp.concatenate(rows, axis=0) if B > 1 else rows[0]      # (B, 2*HW)

    # 7x7 conv (2->1 ch, pad 3) + BatchNorm scale as a single bf16 MXU matmul.
    conv = jnp.dot(cm.astype(jnp.bfloat16), amat_ref[...],
                   preferred_element_type=jnp.float32)            # (B, HW)
    scale = jax.nn.sigmoid(conv + shift_ref[0])                   # (B, HW)

    for b in range(B):
        xb = x_ref[b].astype(jnp.float32)
        x1b = xb * ca[:, b:b + 1]                                 # cheap VPU recompute
        o_ref[b] = (x1b * scale[b:b + 1, :]).astype(o_ref.dtype)  # sublane-broadcast


# -------------- one-time model-init prep (NOT inside the per-call jit) --------------
def prepare_cbam_params(conv_w, bn_scale, bn_shift, H, W):
    """Build the dense (2*H*W, H*W) matrix equivalent to
    Conv2d(2, 1, 7, padding=3, bias=False) on flattened spatial maps, with the
    eval-mode BatchNorm scale folded in. Returned in bf16 (the MXU-native dtype).
    Must be rebuilt if conv_w / BN stats ever change (e.g. fine-tuning)."""
    conv_w = np.asarray(conv_w, dtype=np.float32)
    HW = H * W
    idx = np.arange(HW)
    qi, qj = idx // W, idx % W
    dh = qi[:, None] - qi[None, :]                 # source row - dest row  -> kh - 3
    dw = qj[:, None] - qj[None, :]                 # source col - dest col  -> kw - 3
    valid = (np.abs(dh) <= 3) & (np.abs(dw) <= 3)
    kidx = np.where(valid, (dh + 3) * 7 + (dw + 3), 0).astype(np.int32)

    w_flat = conv_w[0].reshape(2, 49) * np.float32(bn_scale)
    a_max = np.where(valid, w_flat[0][kidx], 0.0)          # (HW, HW)  max channel
    a_mean = np.where(valid, w_flat[1][kidx], 0.0)         # (HW, HW)  mean channel
    amat = np.concatenate([a_max, a_mean], axis=0).astype(np.float32)   # (2*HW, HW)

    return (jnp.asarray(amat, dtype=jnp.bfloat16),
            jnp.asarray(np.array([bn_shift], dtype=np.float32)))


# ------------------------------ wrapper --------------------------------------
@jax.jit
def cbam_forward(x, w1, w2, amat, shift):
    """x: (B, C, H, W) f32; w1: (hidden, C); w2: (C, hidden);
    amat: (2*H*W, H*W) bf16 (pre-built); shift: (1,) f32 (folded BN shift)."""
    B, C, H, W = x.shape
    hidden = w1.shape[0]
    HW = H * W

    x_flat = x.reshape(B, C, HW)                            # lane-dense layout

    grid_spec = pltpu.PrefetchScalarGridSpec(
        num_scalar_prefetch=0,
        grid=(1,),                                          # whole batch in one step
        in_specs=[
            pl.BlockSpec((B, C, HW), lambda i: (0, 0, 0)),
            pl.BlockSpec((hidden, C), lambda i: (0, 0)),
            pl.BlockSpec((C, hidden), lambda i: (0, 0)),
            pl.BlockSpec((2 * HW, HW), lambda i: (0, 0)),
            pl.BlockSpec(memory_space=pltpu.MemorySpace.SMEM),
        ],
        out_specs=pl.BlockSpec((B, C, HW), lambda i: (0, 0, 0)),
    )

    # Advisory cost: spatial matmul + batched MLP + elementwise; bytes = x in/out + amat + weights.
    flops = (2 * B * (2 * HW) * HW          # spatial conv matmul
             + 2 * 2 * hidden * C * (2 * B) # two MLP layers, batched over 2B columns
             + 6 * B * C * HW)              # pools + rescales (elementwise)
    transcendentals = B * (C + HW)          # sigmoids
    bytes_accessed = (2 * B * C * HW * 4    # x in + out (f32)
                      + 2 * HW * HW * 2     # amat (bf16)
                      + (hidden * C * 2) * 4)

    out_flat = pl.pallas_call(
        cbam_kernel,
        out_shape=jax.ShapeDtypeStruct((B, C, HW), x.dtype),
        grid_spec=grid_spec,
        compiler_params=pltpu.CompilerParams(
            dimension_semantics=("arbitrary",),
            vmem_limit_bytes=32 * 1024 * 1024),
        cost_estimate=pl.CostEstimate(flops=flops,
                                      transcendentals=transcendentals,
                                      bytes_accessed=bytes_accessed),
    )(x_flat, w1, w2, amat, shift)

    return out_flat.reshape(B, C, H, W)


# ------------------------- pure-JAX reference ---------------------------------
def cbam_reference(x, w1, w2, conv_w, bn_scale, bn_shift):
    avg = jnp.mean(x, axis=(2, 3))
    mx = jnp.max(x, axis=(2, 3))

    def mlp(v):
        return jnp.maximum(v @ w1.T, 0.0) @ w2.T

    ca = jax.nn.sigmoid(mlp(avg) + mlp(mx))                 # (B, C)
    x1 = x * ca[:, :, None, None]

    ch_max = jnp.max(x1, axis=1, keepdims=True)
    ch_mean = jnp.mean(x1, axis=1, keepdims=True)
    comp = jnp.concatenate([ch_max, ch_mean], axis=1)       # (B, 2, H, W)
    conv = jax.lax.conv_general_dilated(
        comp, conv_w, window_strides=(1, 1), padding=((3, 3), (3, 3)),
        dimension_numbers=("NCHW", "OIHW", "NCHW"))
    conv = conv * bn_scale + bn_shift
    return x1 * jax.nn.sigmoid(conv)


# --------------------------------- main ---------------------------------------
if __name__ == "__main__":
    B, C, H, W = 2, 64, 16, 16
    reduction_ratio = 16
    hidden = C // reduction_ratio            # 4
    eps = 1e-5

    key = jax.random.PRNGKey(0)
    kx, k1, k2, k3 = jax.random.split(key, 4)

    x = jax.random.normal(kx, (B, C, H, W), dtype=jnp.float32)

    # Deterministic synthetic parameters (shapes follow the PyTorch module).
    w1 = 0.1 * jax.random.normal(k1, (hidden, C), dtype=jnp.float32)    # fc1 weight
    w2 = 0.1 * jax.random.normal(k2, (C, hidden), dtype=jnp.float32)    # fc2 weight
    conv_w = 0.1 * jax.random.normal(k3, (1, 2, 7, 7), dtype=jnp.float32)

    # BatchNorm2d(1) parameters (PyTorch defaults), applied in eval mode.
    gamma, beta = 1.0, 0.0
    running_mean, running_var = 0.0, 1.0
    bn_scale = gamma / float(np.sqrt(running_var + eps))
    bn_shift = beta - running_mean * bn_scale

    # One-time (model-init) prework: dense conv matrix in bf16 + folded BN shift.
    amat, shift = prepare_cbam_params(np.asarray(conv_w), bn_scale, bn_shift, H, W)

    out = cbam_forward(x, w1, w2, amat, shift)
    out = jax.block_until_ready(out)

    ref = cbam_reference(x, w1, w2, conv_w, jnp.float32(bn_scale), jnp.float32(bn_shift))
    # Tolerance relaxed vs. the pure-f32 variant: the spatial conv matmul now runs with
    # bf16 inputs on the MXU (f32 accumulation), ~1e-3 relative error before the sigmoid.
    np.testing.assert_allclose(np.asarray(out), np.asarray(ref),
                               rtol=2e-2, atol=2e-2)

    print("KERNEL_OK")
</pallas_src>

<mosaic_0001>
module attributes {stable_mosaic.version = 11 : i64} {
  func.func @cbam_kernel(%arg0: i32, %arg1: memref<2x64x256xf32, #tpu.memory_space<vmem>>, %arg2: memref<4x64xf32, #tpu.memory_space<vmem>>, %arg3: memref<64x4xf32, #tpu.memory_space<vmem>>, %arg4: memref<512x256xbf16, #tpu.memory_space<vmem>>, %arg5: memref<1xf32, #tpu.memory_space<smem>>, %arg6: memref<2x64x256xf32, #tpu.memory_space<vmem>>) attributes {dimension_semantics = [#tpu.dimension_semantics<arbitrary>], iteration_bounds = array<i64: 1>, scalar_prefetch = 0 : i64, scratch_operands = 0 : i64, tpu.core_type = #tpu.core_type<tc>, window_params = [{pipeline_mode = #tpu.pipeline_mode<synchronous>, transform_indices = @transform_0, window_bounds = array<i64: 2, 64, 256>}, {pipeline_mode = #tpu.pipeline_mode<synchronous>, transform_indices = @transform_1, window_bounds = array<i64: 4, 64>}, {pipeline_mode = #tpu.pipeline_mode<synchronous>, transform_indices = @transform_2, window_bounds = array<i64: 64, 4>}, {pipeline_mode = #tpu.pipeline_mode<synchronous>, transform_indices = @transform_3, window_bounds = array<i64: 512, 256>}, {transform_indices = @transform_4, window_bounds = array<i64: 1>}, {pipeline_mode = #tpu.pipeline_mode<synchronous>, transform_indices = @transform_5, window_bounds = array<i64: 2, 64, 256>}]} {
    %c0 = arith.constant 0 : index
    %c0_0 = arith.constant 0 : index
    %c0_1 = arith.constant 0 : index
    %0 = vector.load %arg1[%c0, %c0_0, %c0_1] : memref<2x64x256xf32, #tpu.memory_space<vmem>>, vector<1x64x256xf32>
    %1 = vector.shape_cast %0 : vector<1x64x256xf32> to vector<64x256xf32>
    %2 = vector.extract_strided_slice %1 {offsets = [0, 0], sizes = [64, 128], strides = [1, 1]} : vector<64x256xf32> to vector<64x128xf32>
    %3 = vector.extract_strided_slice %1 {offsets = [0, 128], sizes = [64, 128], strides = [1, 1]} : vector<64x256xf32> to vector<64x128xf32>
    %4 = arith.addf %2, %3 : vector<64x128xf32>
    %5 = arith.maximumf %2, %3 : vector<64x128xf32>
    %cst = arith.constant dense<0.000000e+00> : vector<64xf32>
    %6 = vector.multi_reduction <add>, %4, %cst [1] : vector<64x128xf32> to vector<64xf32>
    %7 = vector.shape_cast %6 : vector<64xf32> to vector<64x1xf32>
    %cst_2 = arith.constant 3.906250e-03 : f32
    %8 = vector.broadcast %cst_2 : f32 to vector<64x1xf32>
    %9 = arith.mulf %7, %8 : vector<64x1xf32>
    %cst_3 = arith.constant dense<0xFF800000> : vector<64xf32>
    %10 = vector.multi_reduction <maximumf>, %5, %cst_3 [1] : vector<64x128xf32> to vector<64xf32>
    %11 = vector.shape_cast %10 : vector<64xf32> to vector<64x1xf32>
    %c1 = arith.constant 1 : index
    %c0_4 = arith.constant 0 : index
    %c0_5 = arith.constant 0 : index
    %12 = vector.load %arg1[%c1, %c0_4, %c0_5] : memref<2x64x256xf32, #tpu.memory_space<vmem>>, vector<1x64x256xf32>
    %13 = vector.shape_cast %12 : vector<1x64x256xf32> to vector<64x256xf32>
    %14 = vector.extract_strided_slice %13 {offsets = [0, 0], sizes = [64, 128], strides = [1, 1]} : vector<64x256xf32> to vector<64x128xf32>
    %15 = vector.extract_strided_slice %13 {offsets = [0, 128], sizes = [64, 128], strides = [1, 1]} : vector<64x256xf32> to vector<64x128xf32>
    %16 = arith.addf %14, %15 : vector<64x128xf32>
    %17 = arith.maximumf %14, %15 : vector<64x128xf32>
    %cst_6 = arith.constant dense<0.000000e+00> : vector<64xf32>
    %18 = vector.multi_reduction <add>, %16, %cst_6 [1] : vector<64x128xf32> to vector<64xf32>
    %19 = vector.shape_cast %18 : vector<64xf32> to vector<64x1xf32>
    %cst_7 = arith.constant 3.906250e-03 : f32
    %20 = vector.broadcast %cst_7 : f32 to vector<64x1xf32>
    %21 = arith.mulf %19, %20 : vector<64x1xf32>
    %cst_8 = arith.constant dense<0xFF800000> : vector<64xf32>
    %22 = vector.multi_reduction <maximumf>, %17, %cst_8 [1] : vector<64x128xf32> to vector<64xf32>
    %23 = vector.shape_cast %22 : vector<64xf32> to vector<64x1xf32>
    %24 = tpu.concatenate %9, %21, %11, %23 in 1 : vector<64x1xf32>, vector<64x1xf32>, vector<64x1xf32>, vector<64x1xf32> -> vector<64x4xf32>
    %c0_9 = arith.constant 0 : index
    %c0_10 = arith.constant 0 : index
    %25 = vector.load %arg2[%c0_9, %c0_10] : memref<4x64xf32, #tpu.memory_space<vmem>>, vector<4x64xf32>
    %cst_11 = arith.constant dense<0.000000e+00> : vector<4x4xf32>
    %26 = tpu.matmul %25, %24, %cst_11 {dimension_numbers = #tpu.dot_dimension_numbers<[1], [0], [0], [1], [0, 0, 1, 1], [], []>} : vector<4x64xf32>, vector<64x4xf32>, vector<4x4xf32> -> vector<4x4xf32>
    %cst_12 = arith.constant 0.000000e+00 : f32
    %27 = vector.broadcast %cst_12 : f32 to vector<4x4xf32>
    %28 = arith.maximumf %26, %27 : vector<4x4xf32>
    %c0_13 = arith.constant 0 : index
    %c0_14 = arith.constant 0 : index
    %29 = vector.load %arg3[%c0_13, %c0_14] : memref<64x4xf32, #tpu.memory_space<vmem>>, vector<64x4xf32>
    %cst_15 = arith.constant dense<0.000000e+00> : vector<64x4xf32>
    %30 = tpu.matmul %29, %28, %cst_15 {dimension_numbers = #tpu.dot_dimension_numbers<[1], [0], [0], [1], [0, 0, 1, 1], [], []>} : vector<64x4xf32>, vector<4x4xf32>, vector<64x4xf32> -> vector<64x4xf32>
    %31 = vector.extract_strided_slice %30 {offsets = [0, 0], sizes = [64, 2], strides = [1, 1]} : vector<64x4xf32> to vector<64x2xf32>
    %32 = vector.extract_strided_slice %30 {offsets = [0, 2], sizes = [64, 2], strides = [1, 1]} : vector<64x4xf32> to vector<64x2xf32>
    %33 = arith.addf %31, %32 : vector<64x2xf32>
    %34 = arith.negf %33 : vector<64x2xf32>
    %35 = math.exp %34 : vector<64x2xf32>
    %cst_16 = arith.constant 1.000000e+00 : f32
    %36 = vector.broadcast %cst_16 : f32 to vector<64x2xf32>
    %37 = arith.addf %36, %35 : vector<64x2xf32>
    %38 = arith.divf %36, %37 : vector<64x2xf32>
    %c0_17 = arith.constant 0 : index
    %c0_18 = arith.constant 0 : index
    %c0_19 = arith.constant 0 : index
    %39 = vector.load %arg1[%c0_17, %c0_18, %c0_19] : memref<2x64x256xf32, #tpu.memory_space<vmem>>, vector<1x64x256xf32>
    %40 = vector.shape_cast %39 : vector<1x64x256xf32> to vector<64x256xf32>
    %41 = vector.extract_strided_slice %38 {offsets = [0, 0], sizes = [64, 1], strides = [1, 1]} : vector<64x2xf32> to vector<64x1xf32>
    %42 = vector.broadcast %41 : vector<64x1xf32> to vector<64x256xf32>
    %43 = arith.mulf %40, %42 : vector<64x256xf32>
    %44 = vector.extract_strided_slice %43 {offsets = [0, 0], sizes = [32, 256], strides = [1, 1]} : vector<64x256xf32> to vector<32x256xf32>
    %45 = vector.extract_strided_slice %43 {offsets = [32, 0], sizes = [32, 256], strides = [1, 1]} : vector<64x256xf32> to vector<32x256xf32>
    %46 = arith.addf %44, %45 : vector<32x256xf32>
    %47 = arith.maximumf %44, %45 : vector<32x256xf32>
    %cst_20 = arith.constant dense<0xFF800000> : vector<256xf32>
    %48 = vector.multi_reduction <maximumf>, %47, %cst_20 [0] : vector<32x256xf32> to vector<256xf32>
    %49 = vector.shape_cast %48 : vector<256xf32> to vector<1x256xf32>
    %cst_21 = arith.constant dense<0.000000e+00> : vector<256xf32>
    %50 = vector.multi_reduction <add>, %46, %cst_21 [0] : vector<32x256xf32> to vector<256xf32>
    %51 = vector.shape_cast %50 : vector<256xf32> to vector<1x256xf32>
    %cst_22 = arith.constant 1.562500e-02 : f32
    %52 = vector.broadcast %cst_22 : f32 to vector<1x256xf32>
    %53 = arith.mulf %51, %52 : vector<1x256xf32>
    %54 = tpu.concatenate %49, %53 in 1 : vector<1x256xf32>, vector<1x256xf32> -> vector<1x512xf32>
    %c1_23 = arith.constant 1 : index
    %c0_24 = arith.constant 0 : index
    %c0_25 = arith.constant 0 : index
    %55 = vector.load %arg1[%c1_23, %c0_24, %c0_25] : memref<2x64x256xf32, #tpu.memory_space<vmem>>, vector<1x64x256xf32>
    %56 = vector.shape_cast %55 : vector<1x64x256xf32> to vector<64x256xf32>
    %57 = vector.extract_strided_slice %38 {offsets = [0, 1], sizes = [64, 1], strides = [1, 1]} : vector<64x2xf32> to vector<64x1xf32>
    %58 = vector.broadcast %57 : vector<64x1xf32> to vector<64x256xf32>
    %59 = arith.mulf %56, %58 : vector<64x256xf32>
    %60 = vector.extract_strided_slice %59 {offsets = [0, 0], sizes = [32, 256], strides = [1, 1]} : vector<64x256xf32> to vector<32x256xf32>
    %61 = vector.extract_strided_slice %59 {offsets = [32, 0], sizes = [32, 256], strides = [1, 1]} : vector<64x256xf32> to vector<32x256xf32>
    %62 = arith.addf %60, %61 : vector<32x256xf32>
    %63 = arith.maximumf %60, %61 : vector<32x256xf32>
    %cst_26 = arith.constant dense<0xFF800000> : vector<256xf32>
    %64 = vector.multi_reduction <maximumf>, %63, %cst_26 [0] : vector<32x256xf32> to vector<256xf32>
    %65 = vector.shape_cast %64 : vector<256xf32> to vector<1x256xf32>
    %cst_27 = arith.constant dense<0.000000e+00> : vector<256xf32>
    %66 = vector.multi_reduction <add>, %62, %cst_27 [0] : vector<32x256xf32> to vector<256xf32>
    %67 = vector.shape_cast %66 : vector<256xf32> to vector<1x256xf32>
    %cst_28 = arith.constant 1.562500e-02 : f32
    %68 = vector.broadcast %cst_28 : f32 to vector<1x256xf32>
    %69 = arith.mulf %67, %68 : vector<1x256xf32>
    %70 = tpu.concatenate %65, %69 in 1 : vector<1x256xf32>, vector<1x256xf32> -> vector<1x512xf32>
    %71 = tpu.concatenate %54, %70 in 0 : vector<1x512xf32>, vector<1x512xf32> -> vector<2x512xf32>
    %72 = arith.truncf %71 : vector<2x512xf32> to vector<2x512xbf16>
    %c0_29 = arith.constant 0 : index
    %c0_30 = arith.constant 0 : index
    %73 = vector.load %arg4[%c0_29, %c0_30] : memref<512x256xbf16, #tpu.memory_space<vmem>>, vector<512x256xbf16>
    %cst_31 = arith.constant dense<0.000000e+00> : vector<2x256xf32>
    %74 = tpu.matmul %72, %73, %cst_31 {dimension_numbers = #tpu.dot_dimension_numbers<[1], [0], [0], [1], [0, 0, 1, 1], [], []>} : vector<2x512xbf16>, vector<512x256xbf16>, vector<2x256xf32> -> vector<2x256xf32>
    %c0_32 = arith.constant 0 : index
    %75 = memref.load %arg5[%c0_32] : memref<1xf32, #tpu.memory_space<smem>>
    %76 = vector.broadcast %75 : f32 to vector<2x256xf32>
    %77 = arith.addf %74, %76 : vector<2x256xf32>
    %78 = arith.negf %77 : vector<2x256xf32>
    %79 = math.exp %78 : vector<2x256xf32>
    %cst_33 = arith.constant 1.000000e+00 : f32
    %80 = vector.broadcast %cst_33 : f32 to vector<2x256xf32>
    %81 = arith.addf %80, %79 : vector<2x256xf32>
    %82 = arith.divf %80, %81 : vector<2x256xf32>
    %c0_34 = arith.constant 0 : index
    %c0_35 = arith.constant 0 : index
    %c0_36 = arith.constant 0 : index
    %83 = vector.load %arg1[%c0_34, %c0_35, %c0_36] : memref<2x64x256xf32, #tpu.memory_space<vmem>>, vector<1x64x256xf32>
    %84 = vector.shape_cast %83 : vector<1x64x256xf32> to vector<64x256xf32>
    %85 = vector.extract_strided_slice %38 {offsets = [0, 0], sizes = [64, 1], strides = [1, 1]} : vector<64x2xf32> to vector<64x1xf32>
    %86 = vector.broadcast %85 : vector<64x1xf32> to vector<64x256xf32>
    %87 = arith.mulf %84, %86 : vector<64x256xf32>
    %88 = vector.extract_strided_slice %82 {offsets = [0, 0], sizes = [1, 256], strides = [1, 1]} : vector<2x256xf32> to vector<1x256xf32>
    %89 = vector.broadcast %88 : vector<1x256xf32> to vector<64x256xf32>
    %90 = arith.mulf %87, %89 : vector<64x256xf32>
    %c0_37 = arith.constant 0 : index
    %c0_38 = arith.constant 0 : index
    %c0_39 = arith.constant 0 : index
    %91 = vector.load %arg6[%c0_37, %c0_38, %c0_39] : memref<2x64x256xf32, #tpu.memory_space<vmem>>, vector<1x64x256xf32>
    %92 = vector.shape_cast %91 : vector<1x64x256xf32> to vector<64x256xf32>
    %93 = vector.shape_cast %90 : vector<64x256xf32> to vector<1x64x256xf32>
    tpu.vector_store %arg6[%c0_37, %c0_38, %c0_39], %93 {strides = array<i32>} : memref<2x64x256xf32, #tpu.memory_space<vmem>>, vector<1x64x256xf32>,
    %c1_40 = arith.constant 1 : index
    %c0_41 = arith.constant 0 : index
    %c0_42 = arith.constant 0 : index
    %94 = vector.load %arg1[%c1_40, %c0_41, %c0_42] : memref<2x64x256xf32, #tpu.memory_space<vmem>>, vector<1x64x256xf32>
    %95 = vector.shape_cast %94 : vector<1x64x256xf32> to vector<64x256xf32>
    %96 = vector.extract_strided_slice %38 {offsets = [0, 1], sizes = [64, 1], strides = [1, 1]} : vector<64x2xf32> to vector<64x1xf32>
    %97 = vector.broadcast %96 : vector<64x1xf32> to vector<64x256xf32>
    %98 = arith.mulf %95, %97 : vector<64x256xf32>
    %99 = vector.extract_strided_slice %82 {offsets = [1, 0], sizes = [1, 256], strides = [1, 1]} : vector<2x256xf32> to vector<1x256xf32>
    %100 = vector.broadcast %99 : vector<1x256xf32> to vector<64x256xf32>
    %101 = arith.mulf %98, %100 : vector<64x256xf32>
    %c1_43 = arith.constant 1 : index
    %c0_44 = arith.constant 0 : index
    %c0_45 = arith.constant 0 : index
    %102 = vector.load %arg6[%c1_43, %c0_44, %c0_45] : memref<2x64x256xf32, #tpu.memory_space<vmem>>, vector<1x64x256xf32>
    %103 = vector.shape_cast %102 : vector<1x64x256xf32> to vector<64x256xf32>
    %104 = vector.shape_cast %101 : vector<64x256xf32> to vector<1x64x256xf32>
    tpu.vector_store %arg6[%c1_43, %c0_44, %c0_45], %104 {strides = array<i32>} : memref<2x64x256xf32, #tpu.memory_space<vmem>>, vector<1x64x256xf32>,
    return
  }
  func.func @transform_0(%arg0: i32) -> (i32, i32, i32) {
    %c0_i32 = arith.constant 0 : i32
    %c0_i32_0 = arith.constant 0 : i32
    %c0_i32_1 = arith.constant 0 : i32
    %c0_i32_2 = arith.constant 0 : i32
    return %c0_i32, %c0_i32_0, %c0_i32_1 : i32, i32, i32
  }
  func.func @transform_1(%arg0: i32) -> (i32, i32) {
    %c0_i32 = arith.constant 0 : i32
    %c0_i32_0 = arith.constant 0 : i32
    %c0_i32_1 = arith.constant 0 : i32
    return %c0_i32, %c0_i32_0 : i32, i32
  }
  func.func @transform_2(%arg0: i32) -> (i32, i32) {
    %c0_i32 = arith.constant 0 : i32
    %c0_i32_0 = arith.constant 0 : i32
    %c0_i32_1 = arith.constant 0 : i32
    return %c0_i32, %c0_i32_0 : i32, i32
  }
  func.func @transform_3(%arg0: i32) -> (i32, i32) {
    %c0_i32 = arith.constant 0 : i32
    %c0_i32_0 = arith.constant 0 : i32
    %c0_i32_1 = arith.constant 0 : i32
    return %c0_i32, %c0_i32_0 : i32, i32
  }
  func.func @transform_4(%arg0: i32) -> i32 {
    %c0_i32 = arith.constant 0 : i32
    %c0_i32_0 = arith.constant 0 : i32
    return %c0_i32 : i32
  }
  func.func @transform_5(%arg0: i32) -> (i32, i32, i32) {
    %c0_i32 = arith.constant 0 : i32
    %c0_i32_0 = arith.constant 0 : i32
    %c0_i32_1 = arith.constant 0 : i32
    %c0_i32_2 = arith.constant 0 : i32
    return %c0_i32, %c0_i32_0, %c0_i32_1 : i32, i32, i32
  }
}

</mosaic_0001>

<bundles_post_ra>
// kernel: cbam_forward.1
= control target key start
LH: loop header
LB: loop body
LE: loop exit
PB: predicated region body
PF: predicated region fallthrough
CT: control target
= control target key end

     0   :  { %v1704_v45 = vmov 0.0|0.0   ;;  %vm1705_vm0 = vmmov 0   ;;  %vm166_vm1 = vcmask 7168   ;;  %vm175_vm2 = vcmask 15360   ;;  %s1707_s24 = smov 126   ;;  %s2482_s0 = inlined_call_operand.vmem [shape: f32[2,64,256], index: 0, kind: input, shape index: {}]   ;;  %s2483_s1 = inlined_call_operand.vmem [shape: f32[4,64], index: 1, kind: input, shape index: {}]   ;;  %s2484_s2 = inlined_call_operand.vmem [shape: f32[64,4], index: 2, kind: input, shape index: {}]   ;;  %s2485_s3 = inlined_call_operand.vmem [shape: bf16[512,256], index: 3, kind: input, shape index: {}]   ;;  %s2486_s4 = inlined_call_operand.<no memory space> [shape: f32[1], index: 4, kind: input, shape index: {}]   ;;  %s2487_s5 = inlined_call_operand.vmem [shape: f32[2,64,256], index: 5, kind: output, shape index: {}]  }
   0x1   :  { %v1329_v0 = vld [vmem:[%s2482_s0 + $0x80] sm:$0xff]  ;;  %v1330_v1 = vld [vmem:[%s2482_s0 + $0x88] sm:$0xff]  ;;  %v1331_v5 = vld [vmem:[%s2482_s0 + $0x90] sm:$0xff]  ;;  %1512 = vmatprep.subr.bf16.mxu0 %v1704_v45  ;;  %vm184_vm3 = vcmask 23552   ;;  %vm194_vm4 = vcmask 523264   ;;  %vm277_vm5 = vcmask 31744  }
   0x2   :  { %v21_v2 = vld [vmem:[%s2482_s0] sm:$0xff]  ;;  %v110_v3 = vadd.f32 %v1330_v1, %v1329_v0  ;;  %v22_v4 = vld [vmem:[%s2482_s0 + $0x8] sm:$0xff]  ;;  %v1332_v6 = vld [vmem:[%s2482_s0 + $0x98] sm:$0xff]  ;;  %v118_v27 = vmax.f32 %v1329_v0, %v1330_v1  ;;  %v1706_v1 = vmov 0.0   ;;  %vm302_vm6 = vcmask 1043456  }
   0x3   :  { %v37_v7 = vadd.f32 %v22_v4, %v21_v2  ;;  %v23_v8 = vld [vmem:[%s2482_s0 + $0x10] sm:$0xff]  ;;  %v24_v9 = vld [vmem:[%s2482_s0 + $0x18] sm:$0xff]  ;;  %v111_v10 = vadd.f32 %v1332_v6, %v1331_v5  ;;  %v45_v13 = vmax.f32 %v21_v2, %v22_v4  ;;  %v25_v16 = vld [vmem:[%s2482_s0 + $0x20] sm:$0xff]  ;;  %v119_v26 = vmax.f32 %v1331_v5, %v1332_v6  ;;  %1495 = vmatprep.mubr.msk.f32.mxu0 %vm1705_vm0, %v1706_v1 }
   0x4   :  { %126 = vadd.xlane.f32.xlu1 %v110_v3  ;;  %v38_v11 = vadd.f32 %v24_v9, %v23_v8  ;;  %v46_v12 = vmax.f32 %v23_v8, %v24_v9  ;;  %v27_v14 = vld [vmem:[%s2482_s0 + $0x30] sm:$0xff]  ;;  %v28_v15 = vld [vmem:[%s2482_s0 + $0x38] sm:$0xff]  ;;  %v26_v17 = vld [vmem:[%s2482_s0 + $0x28] sm:$0xff]  ;;  %vm723_vm7 = vcmask 1040384  }
   0x5   :  { %53 = vadd.xlane.f32.xlu0 %v37_v7  ;;  %v40_v18 = vadd.f32 %v28_v15, %v27_v14  ;;  %v39_v19 = vadd.f32 %v26_v17, %v25_v16  ;;  %v1335_v20 = vld [vmem:[%s2482_s0 + $0xb0] sm:$0xff]  ;;  %v1336_v21 = vld [vmem:[%s2482_s0 + $0xb8] sm:$0xff]  ;;  %v1333_v22 = vld [vmem:[%s2482_s0 + $0xa0] sm:$0xff]  ;;  %v48_v28 = vmax.f32 %v27_v14, %v28_v15  ;;  %v47_v29 = vmax.f32 %v25_v16, %v26_v17 }
   0x6   :  { %v1334_v23 = vld [vmem:[%s2482_s0 + $0xa8] sm:$0xff]  ;;  %v113_v24 = vadd.f32 %v1336_v21, %v1335_v20  ;;  %v1791_v30 = vld [vmem:[%s2482_s0 + $0x50] sm:$0xff]  ;;  %v1796_v31 = vld [vmem:[%s2482_s0 + $0x58] sm:$0xff]  ;;  %v121_v42 = vmax.f32 %v1335_v20, %v1336_v21 }
   0x7   :  { %v112_v25 = vadd.f32 %v1334_v23, %v1333_v22  ;;  %v29_v32 = vld [vmem:[%s2482_s0 + $0x40] sm:$0xff]  ;;  %v30_v33 = vld [vmem:[%s2482_s0 + $0x48] sm:$0xff]  ;;  %v42_v34 = vadd.f32 %v1796_v31, %v1791_v30  ;;  %v1809_v36 = vld [vmem:[%s2482_s0 + $0xd0] sm:$0xff]  ;;  %v120_v43 = vmax.f32 %v1333_v22, %v1334_v23  ;;  %v50_v44 = vmax.f32 %v1791_v30, %v1796_v31 }
   0x8   :  { %128 = vadd.xlane.f32.xlu1 %v111_v10  ;;  %v41_v35 = vadd.f32 %v30_v33, %v29_v32  ;;  %v1814_v37 = vld [vmem:[%s2482_s0 + $0xd8] sm:$0xff]  ;;  %v1819_v38 = vld [vmem:[%s2482_s0 + $0xc0] sm:$0xff]  ;;  %v1824_v39 = vld [vmem:[%s2482_s0 + $0xc8] sm:$0xff]  ;;  %v49_v46 = vmax.f32 %v29_v32, %v30_v33 }
   0x9   :  { %55 = vadd.xlane.f32.xlu0 %v38_v11  ;;  %v115_v40 = vadd.f32 %v1814_v37, %v1809_v36  ;;  %v114_v41 = vadd.f32 %v1824_v39, %v1819_v38  ;;  %v35_v47 = vld [vmem:[%s2482_s0 + $0x70] sm:$0xff]  ;;  %v36_v48 = vld [vmem:[%s2482_s0 + $0x78] sm:$0xff]  ;;  %v33_v49 = vld [vmem:[%s2482_s0 + $0x60] sm:$0xff]  ;;  %v123_v59 = vmax.f32 %v1809_v36, %v1814_v37  ;;  %v122_v60 = vmax.f32 %v1819_v38, %v1824_v39 }
   0xa   :  { %v34_v50 = vld [vmem:[%s2482_s0 + $0x68] sm:$0xff]  ;;  %v44_v51 = vadd.f32 %v36_v48, %v35_v47  ;;  %v1848_v53 = vld [vmem:[%s2482_s0 + $0xf0] sm:$0xff]  ;;  %v1853_v54 = vld [vmem:[%s2482_s0 + $0xf8] sm:$0xff]  ;;  %v52_v61 = vmax.f32 %v35_v47, %v36_v48 }
   0xb   :  { %v43_v52 = vadd.f32 %v34_v50, %v33_v49  ;;  %v1858_v55 = vld [vmem:[%s2482_s0 + $0xe0] sm:$0xff]  ;;  %v1863_v56 = vld [vmem:[%s2482_s0 + $0xe8] sm:$0xff]  ;;  %v117_v57 = vadd.f32 %v1853_v54, %v1848_v53  ;;  %v51_v62 = vmax.f32 %v33_v49, %v34_v50  ;;  %v125_v63 = vmax.f32 %v1848_v53, %v1853_v54 }
   0xc   :  { %79 = vmax.xlane.f32.xlu1 %v46_v12  ;;  %v116_v58 = vadd.f32 %v1863_v56, %v1858_v55  ;;  %v124_v0 = vmax.f32 %v1858_v55, %v1863_v56 }
   0xd   :  { %77 = vmax.xlane.f32.xlu0 %v45_v13 }
  0x10   :  { %59 = vadd.xlane.f32.xlu1 %v40_v18 }
  0x11   :  { %57 = vadd.xlane.f32.xlu0 %v39_v19 }
  0x14   :  { %132 = vadd.xlane.f32.xlu1 %v113_v24 }
  0x15   :  { %130 = vadd.xlane.f32.xlu0 %v112_v25 }
  0x18   :  { %152 = vmax.xlane.f32.xlu1 %v119_v26 }
  0x19   :  { %150 = vmax.xlane.f32.xlu0 %v118_v27 }
  0x1c   :  { %83 = vmax.xlane.f32.xlu1 %v48_v28 }
  0x1d   :  { %81 = vmax.xlane.f32.xlu0 %v47_v29 }
  0x20   :  { %63 = vadd.xlane.f32.xlu1 %v42_v34 }
  0x21   :  { %61 = vadd.xlane.f32.xlu0 %v41_v35 }
  0x24   :  { %136 = vadd.xlane.f32.xlu1 %v115_v40 }
  0x25   :  { %134 = vadd.xlane.f32.xlu0 %v114_v41 }
  0x28   :  { %156 = vmax.xlane.f32.xlu1 %v121_v42 }
  0x29   :  { %154 = vmax.xlane.f32.xlu0 %v120_v43 }
  0x2c   :  { %87 = vmax.xlane.f32.xlu1 %v50_v44 }
  0x2d   :  { %85 = vmax.xlane.f32.xlu0 %v49_v46 }
  0x30   :  { %67 = vadd.xlane.f32.xlu1 %v44_v51 }
  0x31   :  { %65 = vadd.xlane.f32.xlu0 %v43_v52 }
  0x34   :  { %140 = vadd.xlane.f32.xlu1 %v117_v57 }
  0x35   :  { %138 = vadd.xlane.f32.xlu0 %v116_v58 }
  0x38   :  { %160 = vmax.xlane.f32.xlu1 %v123_v59 }
  0x39   :  { %158 = vmax.xlane.f32.xlu0 %v122_v60 }
  0x3c   :  { %91 = vmax.xlane.f32.xlu1 %v52_v61 }
  0x3d   :  { %89 = vmax.xlane.f32.xlu0 %v51_v62 }
  0x40   :  { %164 = vmax.xlane.f32.xlu1 %v125_v63 }
  0x41   :  { %162 = vmax.xlane.f32.xlu0 %v124_v0 }
  0x91   :  { %v127_v2 = vpop.xlane.xlu1 %126 }
  0x92   :  { %v54_v3 = vpop.xlane.xlu0 %53  ;;  %v142_v12 = vmul.f32 0.00390625, %v127_v2 }
  0x93   :  { %v69_v13 = vmul.f32 0.00390625, %v54_v3 }
  0x95   :  { %v129_v4 = vpop.xlane.xlu1 %128  ;;  %v167_v18 = vsel %vm166_vm1, %v69_v13, %v142_v12 }
  0x96   :  { %v56_v5 = vpop.xlane.xlu0 %55  ;;  %v143_v9 = vmul.f32 0.00390625, %v129_v4 }
  0x97   :  { %v70_v10 = vmul.f32 0.00390625, %v56_v5 }
  0x99   :  { %v80_v6 = vpop.xlane.xlu1 %79  ;;  %v168_v15 = vsel %vm166_vm1, %v70_v10, %v143_v9 }
  0x9a   :  { %v78_v7 = vpop.xlane.xlu0 %77  ;;  %v177_v17 = vsel %vm175_vm2, %v168_v15, %v80_v6 }
  0x9b   :  { %v176_v20 = vsel %vm175_vm2, %v167_v18, %v78_v7 }
  0x9d   :  { %v60_v8 = vpop.xlane.xlu1 %59 }
  0x9e   :  { %v58_v11 = vpop.xlane.xlu0 %57  ;;  %v72_v34 = vmul.f32 0.00390625, %v60_v8 }
  0x9f   :  { %v71_v40 = vmul.f32 0.00390625, %v58_v11 }
  0xa1   :  { %v133_v14 = vpop.xlane.xlu1 %132 }
  0xa2   :  { %v131_v16 = vpop.xlane.xlu0 %130  ;;  %v145_v29 = vmul.f32 0.00390625, %v133_v14 }
  0xa3   :  { %v144_v32 = vmul.f32 0.00390625, %v131_v16 }
  0xa4   :  { %v170_v41 = vsel %vm166_vm1, %v72_v34, %v145_v29  ;;  %v270_v29 = vld [vmem:[%s2484_s2 + $0x8] sm:$0xff]  ;;  %v273_v34 = vld [vmem:[%s2484_s2 + $0x20] sm:$0xff] }
  0xa5   :  { %v153_v19 = vpop.xlane.xlu1 %152  ;;  %v169_v43 = vsel %vm166_vm1, %v71_v40, %v144_v32  ;;  %v271_v32 = vld [vmem:[%s2484_s2 + $0x10] sm:$0xff] }
  0xa6   :  { %v186_v21 = vsel %vm184_vm3, %v177_v17, %v153_v19  ;;  %v151_v22 = vpop.xlane.xlu0 %150  ;;  %v275_v40 = vld [vmem:[%s2484_s2 + $0x30] sm:$0xff] }
  0xa7   :  { %v185_v23 = vsel %vm184_vm3, %v176_v20, %v151_v22 }
  0xa8   :  { %v1513_v24 = vpack.c.bf16 %v186_v21, %v185_v23 }
  0xa9   :  { %v84_v25 = vpop.xlane.xlu1 %83 }
  0xaa   :  { %1514 = vmatpush3.bf16.msra.mxu0 %v1513_v24  ;;  %v82_v26 = vpop.xlane.xlu0 %81  ;;  %v179_v42 = vsel %vm175_vm2, %v170_v41, %v84_v25  ;;  %v269_v25 = vld [vmem:[%s2484_s2] sm:$0xff]  ;;  %v276_v41 = vld [vmem:[%s2484_s2 + $0x38] sm:$0xff] }
  0xab   :  { %1515 = vmatprep.subr.bf16.mxu0 %v1704_v45  ;;  %v178_v46 = vsel %vm175_vm2, %v169_v43, %v82_v26  ;;  %1500 = vmatprep.mubr.msk.f32.mxu1 %vm277_vm5, %v269_v25 }
  0xad   :  { %v64_v27 = vpop.xlane.xlu1 %63 }
  0xae   :  { %v62_v28 = vpop.xlane.xlu0 %61  ;;  %v74_v62 = vmul.f32 0.00390625, %v64_v27 }
  0xaf   :  { %v73_v0 = vmul.f32 0.00390625, %v62_v28 }
  0xb1   :  { %v137_v33 = vpop.xlane.xlu1 %136 }
  0xb2   :  { %v135_v35 = vpop.xlane.xlu0 %134  ;;  %v147_v59 = vmul.f32 0.00390625, %v137_v33  ;;  %v272_v33 = vld [vmem:[%s2484_s2 + $0x18] sm:$0xff] }
  0xb3   :  { %v146_v60 = vmul.f32 0.00390625, %v135_v35  ;;  %v274_v35 = vld [vmem:[%s2484_s2 + $0x28] sm:$0xff] }
  0xb4   :  { %v172_v1 = vsel %vm166_vm1, %v74_v62, %v147_v59 }
  0xb5   :  { %v157_v44 = vpop.xlane.xlu1 %156  ;;  %v171_v3 = vsel %vm166_vm1, %v73_v0, %v146_v60 }
  0xb6   :  { %v188_v47 = vsel %vm184_vm3, %v179_v42, %v157_v44  ;;  %v155_v48 = vpop.xlane.xlu0 %154 }
  0xb7   :  { %v187_v49 = vsel %vm184_vm3, %v178_v46, %v155_v48 }
  0xb8   :  { %v1516_v50 = vpack.c.bf16 %v188_v47, %v187_v49 }
  0xb9   :  { %v88_v51 = vpop.xlane.xlu1 %87 }
  0xba   :  { %1517 = vmatpush3.bf16.msra.mxu0 %v1516_v50  ;;  %v86_v52 = vpop.xlane.xlu0 %85  ;;  %v181_v2 = vsel %vm175_vm2, %v172_v1, %v88_v51  ;;  %v1708_v51 = vmov 0  }
  0xbb   :  { %1518 = vmatprep.subr.bf16.mxu0 %v1704_v45  ;;  %v180_v5 = vsel %vm175_vm2, %v171_v3, %v86_v52  ;;  %1535 = vset.pattern.permute.xlu0 %v1708_v51  ;;  %v1709_v52 = vmov 1  }
  0xbc   :  { %1534 = vset.pattern.permute.xlu1 %v1709_v52 }
  0xbd   :  { %v68_v57 = vpop.xlane.xlu1 %67 }
  0xbe   :  { %v66_v58 = vpop.xlane.xlu0 %65  ;;  %v76_v13 = vmul.f32 0.00390625, %v68_v57 }
  0xbf   :  { %v75_v15 = vmul.f32 0.00390625, %v66_v58 }
  0xc1   :  { %v141_v61 = vpop.xlane.xlu1 %140 }
  0xc2   :  { %v139_v63 = vpop.xlane.xlu0 %138  ;;  %v149_v9 = vmul.f32 0.00390625, %v141_v61 }
  0xc3   :  { %v148_v11 = vmul.f32 0.00390625, %v139_v63 }
  0xc4   :  { %v174_v16 = vsel %vm166_vm1, %v76_v13, %v149_v9 }
  0xc5   :  { %v161_v4 = vpop.xlane.xlu1 %160  ;;  %v173_v18 = vsel %vm166_vm1, %v75_v15, %v148_v11 }
  0xc6   :  { %v190_v6 = vsel %vm184_vm3, %v181_v2, %v161_v4  ;;  %v159_v7 = vpop.xlane.xlu0 %158 }
  0xc7   :  { %v189_v8 = vsel %vm184_vm3, %v180_v5, %v159_v7 }
  0xc8   :  { %v1519_v10 = vpack.c.bf16 %v190_v6, %v189_v8 }
  0xc9   :  { %v92_v12 = vpop.xlane.xlu1 %91 }
  0xca   :  { %1520 = vmatpush3.bf16.msra.mxu0 %v1519_v10  ;;  %v90_v14 = vpop.xlane.xlu0 %89  ;;  %v183_v17 = vsel %vm175_vm2, %v174_v16, %v92_v12 }
  0xcb   :  { %1521 = vmatprep.subr.bf16.mxu0 %v1704_v45  ;;  %v182_v20 = vsel %vm175_vm2, %v173_v18, %v90_v14  ;;  %v193_v45 = vld [vmem:[%s2483_s1] sm:$0xf] }
  0xcd   :  { %v165_v19 = vpop.xlane.xlu1 %164 }
  0xce   :  { %v192_v21 = vsel %vm184_vm3, %v183_v17, %v165_v19  ;;  %v163_v22 = vpop.xlane.xlu0 %162 }
  0xcf   :  { %v191_v23 = vsel %vm184_vm3, %v182_v20, %v163_v22 }
  0xd0   :  { %v1522_v24 = vpack.c.bf16 %v192_v21, %v191_v23 }
  0xd2   :  { %1523 = vmatpush3.bf16.msra.mxu0 %v1522_v24 }
  0xd5   :  { %1496 = vmatmul.mubr.msk.f32.vlgmr.msra.gmra.mrb[0].mxu0 %vm194_vm4, %v193_v45 }
 0x1a8   :  { %v264_v26 = vpop.f32.mrb[0].mxu0 }
 0x1a9   :  { %v268_v27 = vmax.f32 %v264_v26, 0.0  ;;  %v1497_v28 = vpop.f32.mrb[1].mxu0  ;;  %v1546_v26 = vld [vmem:[%s2485_s3] ss:$8 sps:$4 sm:$0xff]  }
 0x1ab   :  { %1498 = vmatprep.subr.msk.mxu1 %vm302_vm6, %v268_v27 }
 0x1ac   :  { %1499 = vmatpush3.msk.msra.mxu1 %vm302_vm6, %v268_v27 }
 0x1ad   :  { %1501 = vmatmul.mubr.msk.f32.vlgmr.msra.gmra.mrb[0].mxu1 %vm277_vm5, %v270_v29  ;;  %v1548_v29 = vld [vmem:[%s2485_s3 + $0x4] ss:$8 sps:$4 sm:$0xff]  }
 0x1ae   :  { %1503 = vmatprep.mubr.msk.f32.mxu1 %vm277_vm5, %v271_v32  ;;  %1118 = vmatprep.subr.bf16.mxu0 %v1548_v29  ;;  %v1609_v29 = vld [vmem:[%s2485_s3 + $0x1a0] ss:$8 sps:$4 sm:$0xff]  }
 0x1af   :  { %1119 = vmatpush1.bf16.msra.mxu0 %v1546_v26  ;;  %v1603_v26 = vld [vmem:[%s2485_s3 + $0x190] ss:$8 sps:$4 sm:$0xff]  }
 0x1b1   :  { %1504 = vmatmul.mubr.msk.f32.gmra.mrb[2].mxu1 %vm277_vm5, %v272_v33  ;;  %v1549_v33 = vld [vmem:[%s2485_s3 + $0x100] ss:$8 sps:$4 sm:$0xff]  }
 0x1b2   :  { %1506 = vmatprep.mubr.msk.f32.mxu1 %vm277_vm5, %v273_v34  ;;  %v1551_v34 = vld [vmem:[%s2485_s3 + $0x104] ss:$8 sps:$4 sm:$0xff]  }
 0x1b3   :  { %1159 = vmatprep.subr.bf16.mxu1 %v1551_v34  ;;  %v1612_v34 = vld [vmem:[%s2485_s3 + $0xb0] ss:$8 sps:$4 sm:$0xff]  }
 0x1b4   :  { %1160 = vmatpush1.bf16.msra.mxu1 %v1549_v33  ;;  %v1617_v33 = vld [vmem:[%s2485_s3 + $0x1b4] ss:$8 sps:$4 sm:$0xff]  }
 0x1b5   :  { %1507 = vmatmul.mubr.msk.f32.gmra.mrb[4].mxu1 %vm277_vm5, %v274_v35 }
 0x1b6   :  { %1509 = vmatprep.mubr.msk.f32.mxu1 %vm277_vm5, %v275_v40  ;;  %v1552_v40 = vld [vmem:[%s2485_s3 + $0x10] ss:$8 sps:$4 sm:$0xff]  }
 0x1b9   :  { %1510 = vmatmul.mubr.msk.f32.gmra.mrb[6].mxu1 %vm277_vm5, %v276_v41  ;;  %v1554_v41 = vld [vmem:[%s2485_s3 + $0x14] ss:$8 sps:$4 sm:$0xff]  }
 0x1ba   :  { %1120 = vmatprep.subr.bf16.mxu0 %v1554_v41  ;;  %v1623_v41 = vld [vmem:[%s2485_s3 + $0x1c4] ss:$8 sps:$4 sm:$0xff]  }
 0x1bb   :  { %1121 = vmatpush1.bf16.msra.mxu0 %v1552_v40  ;;  %v1620_v40 = vld [vmem:[%s2485_s3 + $0xc4] ss:$8 sps:$4 sm:$0xff]  }
 0x280   :  { %v1502_v42 = vpop.f32.mrb[0].mxu1 }
 0x281   :  { %421 = vrot.lane.b32.xlu1 %v1502_v42, %s1707_s24  ;;  %v372_v43 = vpop.f32.mrb[1].mxu1 }
 0x282   :  { %419 = vrot.lane.b32.xlu0 %v372_v43, %s1707_s24 }
 0x284   :  { %v1505_v44 = vpop.f32.mrb[2].mxu1 }
 0x285   :  { %425 = vrot.lane.b32.xlu1 %v1505_v44, %s1707_s24  ;;  %v382_v46 = vpop.f32.mrb[3].mxu1 }
 0x286   :  { %423 = vrot.lane.b32.xlu0 %v382_v46, %s1707_s24 }
 0x288   :  { %v1508_v47 = vpop.f32.mrb[4].mxu1 }
 0x289   :  { %429 = vrot.lane.b32.xlu1 %v1508_v47, %s1707_s24  ;;  %v392_v48 = vpop.f32.mrb[5].mxu1 }
 0x28c   :  { %v1511_v49 = vpop.f32.mrb[6].mxu1 }
 0x28d   :  { %427 = vrot.lane.b32.xlu1 %v392_v48, %s1707_s24  ;;  %v402_v50 = vpop.f32.mrb[7].mxu1 }
 0x28e   :  { %431 = vrot.lane.b32.xlu0 %v402_v50, %s1707_s24 }
 0x291   :  { %433 = vrot.lane.b32.xlu1 %v1511_v49, %s1707_s24 }
 0x2f3   :  { %v422_v57 = vpop.permute.xlu1 %421 }
 0x2f4   :  { %v444_v58 = vadd.f32 %v1502_v42, %v422_v57  ;;  %v420_v59 = vpop.permute.xlu0 %419  ;;  %v1555_v42 = vld [vmem:[%s2485_s3 + $0x110] ss:$8 sps:$4 sm:$0xff]   ;;  %v1561_v57 = vld [vmem:[%s2485_s3 + $0x120] ss:$8 sps:$4 sm:$0xff]  }
 0x2f5   :  { %v443_v60 = vadd.f32 %v420_v59, %v372_v43 }
 0x2f6   :  { %v1356_v61 = vmul.f32 -1.442695, %v444_v58  ;;  %v1563_v58 = vld [vmem:[%s2485_s3 + $0x124] ss:$8 sps:$4 sm:$0xff]  }
 0x2f7   :  { %v1355_v62 = vmul.f32 -1.442695, %v443_v60  ;;  %v426_v63 = vpop.permute.xlu1 %425 }
 0x2f8   :  { %1642 = vpow2.f32 %v1356_v61  ;;  %v446_v0 = vadd.f32 %v1505_v44, %v426_v63  ;;  %v424_v1 = vpop.permute.xlu0 %423  ;;  %v1557_v44 = vld [vmem:[%s2485_s3 + $0x114] ss:$8 sps:$4 sm:$0xff]  }
 0x2f9   :  { %1644 = vpow2.f32 %v1355_v62  ;;  %v445_v2 = vadd.f32 %v424_v1, %v382_v46  ;;  %1161 = vmatprep.subr.bf16.mxu1 %v1557_v44  ;;  %v1566_v61 = vld [vmem:[%s2485_s3 + $0x34] ss:$8 sps:$4 sm:$0xff]   ;;  %v1567_v1 = vld [vmem:[%s2485_s3 + $0x130] ss:$8 sps:$4 sm:$0xff]  }
 0x2fa   :  { %v1358_v3 = vmul.f32 -1.442695, %v446_v0  ;;  %1162 = vmatpush1.bf16.msra.mxu1 %v1555_v42  ;;  %v1569_v62 = vld [vmem:[%s2485_s3 + $0x134] ss:$8 sps:$4 sm:$0xff]   ;;  %v1564_v0 = vld [vmem:[%s2485_s3 + $0x30] ss:$8 sps:$4 sm:$0xff]  }
 0x2fb   :  { %v1357_v4 = vmul.f32 -1.442695, %v445_v2  ;;  %v430_v5 = vpop.permute.xlu1 %429  ;;  %1163 = vmatprep.subr.bf16.mxu1 %v1563_v58  ;;  %v1618_v42 = vld [vmem:[%s2485_s3 + $0xc0] ss:$8 sps:$4 sm:$0xff]   ;;  %v1626_v44 = vld [vmem:[%s2485_s3 + $0xd4] ss:$8 sps:$4 sm:$0xff]  }
 0x2fc   :  { %v448_v6 = vadd.f32 %v1508_v47, %v430_v5  ;;  %v1570_v5 = vld [vmem:[%s2485_s3 + $0x40] ss:$8 sps:$4 sm:$0xff]  }
 0x2fd   :  { %1646 = vpow2.f32 %v1357_v4  ;;  %v1575_v4 = vld [vmem:[%s2485_s3 + $0x144] ss:$8 sps:$4 sm:$0xff]   ;;  %v1633_v58 = vld [vmem:[%s2485_s3 + $0x1e0] ss:$8 sps:$4 sm:$0xff]  }
 0x2fe   :  { %1648 = vpow2.f32 %v1358_v3  ;;  %v1360_v7 = vmul.f32 -1.442695, %v448_v6  ;;  %1164 = vmatpush1.bf16.msra.mxu1 %v1561_v57  ;;  %v1572_v3 = vld [vmem:[%s2485_s3 + $0x44] ss:$8 sps:$4 sm:$0xff]   ;;  %v1573_v6 = vld [vmem:[%s2485_s3 + $0x140] ss:$8 sps:$4 sm:$0xff]  }
 0x2ff   :  { %v428_v8 = vpop.permute.xlu1 %427  ;;  %1165 = vmatprep.subr.bf16.mxu1 %v1569_v62  ;;  %v1630_v57 = vld [vmem:[%s2485_s3 + $0xe0] ss:$8 sps:$4 sm:$0xff]   ;;  %v1639_v62 = vld [vmem:[%s2485_s3 + $0x1f0] ss:$8 sps:$4 sm:$0xff]  }
 0x300   :  { %1650 = vpow2.f32 %v1360_v7  ;;  %v447_v13 = vadd.f32 %v428_v8, %v392_v48  ;;  %v432_v23 = vpop.permute.xlu0 %431  ;;  %v1576_v8 = vld [vmem:[%s2485_s3 + $0x50] ss:$8 sps:$4 sm:$0xff]  }
 0x301   :  { %v449_v45 = vadd.f32 %v432_v23, %v402_v50  ;;  %v1560_v50 = vld [vmem:[%s2485_s3 + $0x24] ss:$8 sps:$4 sm:$0xff]   ;;  %v1594_v23 = vld [vmem:[%s2485_s3 + $0x80] ss:$8 sps:$4 sm:$0xff]  }
 0x302   :  { %v1643_v9 = vpop.eup %1642  ;;  %v1359_v19 = vmul.f32 -1.442695, %v447_v13  ;;  %1122 = vmatprep.subr.bf16.mxu0 %v1560_v50  ;;  %1166 = vmatpush1.bf16.msra.mxu1 %v1567_v1  ;;  %v1587_v13 = vld [vmem:[%s2485_s3 + $0x164] ss:$8 sps:$4 sm:$0xff]  }
 0x303   :  { %v1645_v10 = vpop.eup %1644  ;;  %v476_v11 = vadd.f32 1.0, %v1643_v9  ;;  %v434_v12 = vpop.permute.xlu1 %433  ;;  %v1361_v28 = vmul.f32 -1.442695, %v449_v45  ;;  %1167 = vmatprep.subr.bf16.mxu1 %v1575_v4  ;;  %v1578_v9 = vld [vmem:[%s2485_s3 + $0x54] ss:$8 sps:$4 sm:$0xff]  }
 0x304   :  { %v450_v14 = vadd.f32 %v1511_v49, %v434_v12  ;;  %v475_v15 = vadd.f32 1.0, %v1645_v10  ;;  %v1558_v49 = vld [vmem:[%s2485_s3 + $0x20] ss:$8 sps:$4 sm:$0xff]   ;;  %v1579_v10 = vld [vmem:[%s2485_s3 + $0x150] ss:$8 sps:$4 sm:$0xff]  }
 0x305   :  { %1652 = vrcp.f32 %v476_v11  ;;  %1123 = vmatpush1.bf16.msra.mxu0 %v1558_v49  ;;  %v1581_v11 = vld [vmem:[%s2485_s3 + $0x154] ss:$8 sps:$4 sm:$0xff]   ;;  %v1584_v12 = vld [vmem:[%s2485_s3 + $0x64] ss:$8 sps:$4 sm:$0xff]  }
 0x306   :  { %v1362_v16 = vmul.f32 -1.442695, %v450_v14  ;;  %1124 = vmatprep.subr.bf16.mxu0 %v1566_v61  ;;  %1168 = vmatpush1.bf16.msra.mxu1 %v1573_v6  ;;  %v1582_v14 = vld [vmem:[%s2485_s3 + $0x60] ss:$8 sps:$4 sm:$0xff]   ;;  %v1605_v45 = vld [vmem:[%s2485_s3 + $0x194] ss:$8 sps:$4 sm:$0xff]  }
 0x307   :  { %v1647_v17 = vpop.eup %1646  ;;  %1169 = vmatprep.subr.bf16.mxu1 %v1581_v11  ;;  %v1632_v49 = vld [vmem:[%s2485_s3 + $0xe4] ss:$8 sps:$4 sm:$0xff]   ;;  %v1641_v61 = vld [vmem:[%s2485_s3 + $0x1f4] ss:$8 sps:$4 sm:$0xff]  }
 0x308   :  { %v1649_v18 = vpop.eup %1648  ;;  %1654 = vpow2.f32 %v1362_v16  ;;  %v477_v20 = vadd.f32 1.0, %v1647_v17  ;;  %v1590_v16 = vld [vmem:[%s2485_s3 + $0x74] ss:$8 sps:$4 sm:$0xff]   ;;  %v1635_v50 = vld [vmem:[%s2485_s3 + $0x1e4] ss:$8 sps:$4 sm:$0xff]  }
 0x309   :  { %1656 = vrcp.f32 %v475_v15  ;;  %v478_v22 = vadd.f32 1.0, %v1649_v18  ;;  %1125 = vmatpush1.bf16.msra.mxu0 %v1564_v0  ;;  %v1585_v15 = vld [vmem:[%s2485_s3 + $0x160] ss:$8 sps:$4 sm:$0xff]   ;;  %v1593_v17 = vld [vmem:[%s2485_s3 + $0x174] ss:$8 sps:$4 sm:$0xff]  }
 0x30a   :  { %v1651_v21 = vpop.eup %1650  ;;  %1658 = vpow2.f32 %v1359_v19  ;;  %1126 = vmatprep.subr.bf16.mxu0 %v1572_v3  ;;  %1170 = vmatpush1.bf16.msra.mxu1 %v1579_v10  ;;  %v1588_v18 = vld [vmem:[%s2485_s3 + $0x70] ss:$8 sps:$4 sm:$0xff]  }
 0x30b   :  { %1660 = vrcp.f32 %v477_v20  ;;  %v480_v24 = vadd.f32 1.0, %v1651_v21  ;;  %1171 = vmatprep.subr.bf16.mxu1 %v1587_v13  ;;  %v1591_v19 = vld [vmem:[%s2485_s3 + $0x170] ss:$8 sps:$4 sm:$0xff]   ;;  %v1596_v21 = vld [vmem:[%s2485_s3 + $0x84] ss:$8 sps:$4 sm:$0xff]  }
 0x30c   :  { %1662 = vrcp.f32 %v478_v22  ;;  %v1599_v22 = vld [vmem:[%s2485_s3 + $0x184] ss:$8 sps:$4 sm:$0xff]   ;;  %v1682_v10 = vld [vmem:[%s2482_s0 + $0x90] sm:$0xff] }
 0x30d   :  { %1664 = vrcp.f32 %v480_v24  ;;  %1127 = vmatpush1.bf16.msra.mxu0 %v1570_v5  ;;  %v1602_v24 = vld [vmem:[%s2485_s3 + $0x94] ss:$8 sps:$4 sm:$0xff]  }
 0x30e   :  { %1128 = vmatprep.subr.bf16.mxu0 %v1578_v9  ;;  %1172 = vmatpush1.bf16.msra.mxu1 %v1585_v15 }
 0x30f   :  { %v1653_v25 = vpop.eup %1652  ;;  %1173 = vmatprep.subr.bf16.mxu1 %v1593_v17 }
 0x310   :  { %614 = vperm.xlu1 %1534, %v1653_v25   ;;  %506 = vperm.xlu0 %1535, %v1653_v25   ;;  %v1600_v25 = vld [vmem:[%s2485_s3 + $0x90] ss:$8 sps:$4 sm:$0xff]  }
 0x311   :  { %1129 = vmatpush1.bf16.msra.mxu0 %v1576_v8 }
 0x312   :  { %v1655_v27 = vpop.eup %1654  ;;  %1130 = vmatprep.subr.bf16.mxu0 %v1584_v12  ;;  %1174 = vmatpush1.bf16.msra.mxu1 %v1591_v19  ;;  %v1683_v12 = vld [vmem:[%s2482_s0 + $0x98] sm:$0xff] }
 0x313   :  { %v482_v32 = vadd.f32 1.0, %v1655_v27  ;;  %v1657_v35 = vpop.eup %1656  ;;  %1175 = vmatprep.subr.bf16.mxu1 %v1599_v22  ;;  %v1611_v27 = vld [vmem:[%s2485_s3 + $0x1a4] ss:$8 sps:$4 sm:$0xff]   ;;  %v1687_v22 = vld [vmem:[%s2482_s0 + $0xb8] sm:$0xff] }
 0x314   :  { %1537 = vset.pattern.permute.xlu1 %v1708_v51  ;;  %1536 = vset.pattern.permute.xlu0 %v1709_v52  ;;  %v1659_v43 = vpop.eup %1658 }
 0x315   :  { %1666 = vrcp.f32 %v482_v32  ;;  %501 = vperm.xlu1 %1537, %v1657_v35   ;;  %610 = vperm.xlu0 %1536, %v1657_v35   ;;  %v1661_v46 = vpop.eup %1660  ;;  %v479_v48 = vadd.f32 1.0, %v1659_v43  ;;  %v1614_v32 = vld [vmem:[%s2485_s3 + $0xb4] ss:$8 sps:$4 sm:$0xff]   ;;  %v1615_v35 = vld [vmem:[%s2485_s3 + $0x1b0] ss:$8 sps:$4 sm:$0xff]  }
 0x316   :  { %1668 = vpow2.f32 %v1361_v28  ;;  %v1663_v47 = vpop.eup %1662  ;;  %1131 = vmatpush1.bf16.msra.mxu0 %v1582_v14  ;;  %v1606_v28 = vld [vmem:[%s2485_s3 + $0xa0] ss:$8 sps:$4 sm:$0xff]  }
 0x317   :  { %v1665_v59 = vpop.eup %1664  ;;  %1670 = vrcp.f32 %v479_v48  ;;  %1132 = vmatprep.subr.bf16.mxu0 %v1590_v16  ;;  %v1621_v43 = vld [vmem:[%s2485_s3 + $0x1c0] ss:$8 sps:$4 sm:$0xff]   ;;  %v1627_v48 = vld [vmem:[%s2485_s3 + $0x1d0] ss:$8 sps:$4 sm:$0xff]  }
 0x318   :  { %v1684_v16 = vld [vmem:[%s2482_s0 + $0x10] sm:$0xff] }
 0x319   :  { %1538 = vset.pattern.permute.xlu1 %v1709_v52  ;;  %618 = vperm.xlu0 %1536, %v1661_v46  }
 0x31a   :  { %622 = vperm.xlu1 %1538, %v1663_v47   ;;  %1133 = vmatpush1.bf16.msra.mxu0 %v1588_v18  ;;  %v1685_v18 = vld [vmem:[%s2482_s0 + $0x18] sm:$0xff] }
 0x31b   :  { %1134 = vmatprep.subr.bf16.mxu0 %v1596_v21 }
 0x31d   :  { %630 = vperm.xlu0 %1536, %v1665_v59  }
 0x31e   :  { %1539 = vset.pattern.permute.xlu1 %v1708_v51  ;;  %1135 = vmatpush1.bf16.msra.mxu0 %v1594_v23 }
 0x31f   :  { %v1981_v60 = vpop.eup %1666  ;;  %511 = vperm.xlu1 %1539, %v1661_v46   ;;  %1136 = vmatprep.subr.bf16.mxu0 %v1602_v24  ;;  %v1629_v46 = vld [vmem:[%s2485_s3 + $0x1d4] ss:$8 sps:$4 sm:$0xff]  }
 0x320   :  { %v1669_v63 = vpop.eup %1668 }
 0x321   :  { %638 = vperm.xlu0 %1536, %v1981_v60   ;;  %v481_v2 = vadd.f32 1.0, %v1669_v63  ;;  %v1671_v7 = vpop.eup %1670 }
 0x322   :  { %1137 = vmatpush1.bf16.msra.mxu0 %v1600_v25 }
 0x323   :  { %526 = vperm.xlu1 %1539, %v1665_v59   ;;  %1672 = vrcp.f32 %v481_v2  ;;  %v1638_v59 = vld [vmem:[%s2485_s3 + $0xf4] ss:$8 sps:$4 sm:$0xff]  }
 0x325   :  { %1543 = vset.pattern.permute.xlu0 %v1708_v51 }
 0x326   :  { %516 = vperm.xlu0 %1543, %v1663_v47   ;;  %v1624_v47 = vld [vmem:[%s2485_s3 + $0xd0] ss:$8 sps:$4 sm:$0xff]  }
 0x327   :  { %1540 = vset.pattern.permute.xlu1 %v1709_v52 }
 0x328   :  { %626 = vperm.xlu1 %1540, %v1671_v7  }
 0x32a   :  { %1545 = vset.pattern.permute.xlu0 %v1709_v52 }
 0x32c   :  { %1541 = vset.pattern.permute.xlu1 %v1708_v51 }
 0x32d   :  { %521 = vperm.xlu1 %1541, %v1671_v7   ;;  %v1673_v20 = vpop.eup %1672 }
 0x331   :  { %1542 = vset.pattern.permute.xlu1 %v1709_v52  ;;  %v1597_v52 = vld [vmem:[%s2485_s3 + $0x180] ss:$8 sps:$4 sm:$0xff]  }
 0x332   :  { %634 = vperm.xlu1 %1542, %v1673_v20   ;;  %1176 = vmatpush1.bf16.msra.mxu1 %v1597_v52 }
 0x333   :  { %1177 = vmatprep.subr.bf16.mxu1 %v1605_v45  ;;  %v1689_v45 = vld [vmem:[%s2482_s0 + $0x8] sm:$0xff] }
 0x336   :  { %1544 = vset.pattern.permute.xlu1 %v1708_v51  ;;  %v1608_v51 = vld [vmem:[%s2485_s3 + $0xa4] ss:$8 sps:$4 sm:$0xff]   ;;  %1178 = vmatpush1.bf16.msra.mxu1 %v1603_v26 }
 0x337   :  { %531 = vperm.xlu1 %1544, %v1673_v20   ;;  %1138 = vmatprep.subr.bf16.mxu0 %v1608_v51 }
 0x338   :  { %1179 = vmatprep.subr.bf16.mxu1 %v1611_v27  ;;  %1139 = vmatpush1.bf16.msra.mxu0 %v1606_v28 }
 0x339   :  { %1140 = vmatprep.subr.bf16.mxu0 %v1614_v32 }
 0x33a   :  { %1180 = vmatpush1.bf16.msra.mxu1 %v1609_v29 }
 0x33b   :  { %536 = vperm.xlu1 %1544, %v1981_v60   ;;  %1181 = vmatprep.subr.bf16.mxu1 %v1617_v33  ;;  %v1636_v60 = vld [vmem:[%s2485_s3 + $0xf0] ss:$8 sps:$4 sm:$0xff]  }
 0x33c   :  { %1141 = vmatpush1.bf16.msra.mxu0 %v1612_v34  ;;  %v1692_v34 = vld [vmem:[%s2482_s0 + $0xa0] sm:$0xff] }
 0x33d   :  { %1142 = vmatprep.subr.bf16.mxu0 %v1620_v40  ;;  %v1693_v40 = vld [vmem:[%s2482_s0 + $0xa8] sm:$0xff] }
 0x33e   :  { %1182 = vmatpush1.bf16.msra.mxu1 %v1615_v35 }
 0x33f   :  { %1183 = vmatprep.subr.bf16.mxu1 %v1623_v41 }
 0x340   :  { %1143 = vmatpush1.bf16.msra.mxu0 %v1618_v42 }
 0x341   :  { %1144 = vmatprep.subr.bf16.mxu0 %v1626_v44 }
 0x342   :  { %1184 = vmatpush1.bf16.msra.mxu1 %v1621_v43 }
 0x343   :  { %1185 = vmatprep.subr.bf16.mxu1 %v1629_v46 }
 0x344   :  { %1145 = vmatpush1.bf16.msra.mxu0 %v1624_v47  ;;  %v1694_v47 = vld [vmem:[%s2482_s0 + $0x20] sm:$0xff] }
 0x345   :  { %1146 = vmatprep.subr.bf16.mxu0 %v1632_v49  ;;  %v1695_v49 = vld [vmem:[%s2482_s0 + $0x28] sm:$0xff] }
 0x346   :  { %1186 = vmatpush1.bf16.msra.mxu1 %v1627_v48 }
 0x347   :  { %1187 = vmatprep.subr.bf16.mxu1 %v1635_v50 }
 0x348   :  { %1147 = vmatpush1.bf16.msra.mxu0 %v1630_v57 }
 0x349   :  { %1148 = vmatprep.subr.bf16.mxu0 %v1638_v59 }
 0x34a   :  { %1188 = vmatpush1.bf16.msra.mxu1 %v1633_v58 }
 0x34b   :  { %1189 = vmatprep.subr.bf16.mxu1 %v1641_v61 }
 0x34c   :  { %1149 = vmatpush1.bf16.msra.mxu0 %v1636_v60 }
 0x34e   :  { %1190 = vmatpush1.bf16.msra.mxu1 %v1639_v62 }
 0x38f   :  { %v615_v63 = vpop.permute.xlu1 %614  ;;  %v507_v0 = vpop.permute.xlu0 %506 }
 0x390   :  { %v2150_v11 = vmul.f32 %v1682_v10, %v615_v63  ;;  %v2155_v13 = vmul.f32 %v1683_v12, %v615_v63  ;;  %v2166_v17 = vmul.f32 %v1684_v16, %v507_v0  ;;  %v2171_v19 = vmul.f32 %v1685_v18, %v507_v0 }
 0x392   :  { %2496 = vst [vmem:[#allocation3_spill] sm:$0xff] %v2155_v13 }
 0x394   :  { %v502_v1 = vpop.permute.xlu1 %501  ;;  %v611_v2 = vpop.permute.xlu0 %610 }
 0x395   :  { %v2203_v25 = vmul.f32 %v1689_v45, %v502_v1  ;;  %v1699_v45 = vld [vmem:[%s2482_s0 + $0x38] sm:$0xff] }
 0x398   :  { %v619_v4 = vpop.permute.xlu0 %618 }
 0x399   :  { %v623_v3 = vpop.permute.xlu1 %622  ;;  %v2228_v35 = vmul.f32 %v1692_v34, %v619_v4  ;;  %v2233_v41 = vmul.f32 %v1693_v40, %v619_v4 }
 0x39a   :  { %v2187_v23 = vmul.f32 %v1687_v22, %v623_v3  ;;  %v1698_v22 = vld [vmem:[%s2482_s0 + $0x30] sm:$0xff] }
 0x39b   :  { %2502 = vst [vmem:[#allocation9_spill] sm:$0xff] %v2233_v41 }
 0x39c   :  { %v631_v6 = vpop.permute.xlu0 %630  ;;  %2499 = vst [vmem:[#allocation6_spill] sm:$0xff] %v2187_v23 }
 0x39d   :  { %v2174_v20 = vmul.f32 %v1809_v36, %v631_v6 }
 0x39e   :  { %v512_v5 = vpop.permute.xlu1 %511 }
 0x39f   :  { %v659_v42 = vadd.f32 %v2174_v20, %v2150_v11  ;;  %v2250_v48 = vmul.f32 %v1694_v47, %v512_v5  ;;  %v2255_v50 = vmul.f32 %v1695_v49, %v512_v5 }
 0x3a0   :  { %v639_v8 = vpop.permute.xlu0 %638 }
 0x3a1   :  { %v2158_v14 = vmul.f32 %v1848_v53, %v639_v8  ;;  %v2161_v15 = vmul.f32 %v1853_v54, %v639_v8  ;;  %v2177_v53 = vmul.f32 %v1814_v37, %v631_v6  ;;  %v1686_v54 = vld [vmem:[%s2482_s0 + $0xb0] sm:$0xff]  ;;  %v1688_v37 = vld [vmem:[%s2482_s0] sm:$0xff] }
 0x3a2   :  { %v527_v7 = vpop.permute.xlu1 %526  ;;  %v2182_v21 = vmul.f32 %v1686_v54, %v623_v3  ;;  %v2198_v24 = vmul.f32 %v1688_v37, %v502_v1 }
 0x3a3   :  { %2497 = vst [vmem:[#allocation4_spill] sm:$0xff] %v2161_v15  ;;  %2498 = vst [vmem:[#allocation5_spill] sm:$0xff] %v2177_v53  ;;  %v672_v29 = vmax.f32 %v2187_v23, %v2161_v15  ;;  %v2220_v32 = vmul.f32 %v527_v7, %v1791_v30  ;;  %v2223_v33 = vmul.f32 %v527_v7, %v1796_v31  ;;  %v1696_v7 = vld [vmem:[%s2482_s0 + $0x40] sm:$0xff] }
 0x3a4   :  { %v671_v28 = vmax.f32 %v2182_v21, %v2158_v14  ;;  %v660_v30 = vadd.f32 %v2177_v53, %v2155_v13  ;;  %v667_v31 = vmax.f32 %v2150_v11, %v2174_v20  ;;  %v668_v43 = vmax.f32 %v2155_v13, %v2177_v53 }
 0x3a5   :  { %v663_v57 = vadd.f32 %v2158_v14, %v2182_v21  ;;  %v664_v58 = vadd.f32 %v2161_v15, %v2187_v23  ;;  %v557_v61 = vadd.f32 %v2220_v32, %v2166_v17  ;;  %v558_v62 = vadd.f32 %v2223_v33, %v2171_v19  ;;  %v517_v0 = vpop.permute.xlu0 %516 }
 0x3a6   :  { %v674_v59 = vmax.f32 %v667_v31, %v671_v28  ;;  %v683_v60 = vmax.f32 %v668_v43, %v672_v29  ;;  %v565_v18 = vmax.f32 %v2166_v17, %v2220_v32  ;;  %v566_v54 = vmax.f32 %v2171_v19, %v2223_v33  ;;  %v1701_v43 = vld [vmem:[%s2482_s0 + $0x68] sm:$0xff] }
 0x3a7   :  { %v627_v9 = vpop.permute.xlu1 %626  ;;  %v2300_v37 = vmul.f32 %v1698_v22, %v517_v0  ;;  %v1702_v22 = vld [vmem:[%s2482_s0 + $0x70] sm:$0xff] }
 0x3a8   :  { %v2190_v52 = vmul.f32 %v1819_v38, %v627_v9  ;;  %v2193_v36 = vmul.f32 %v1824_v39, %v627_v9  ;;  %v1690_v38 = vld [vmem:[%s2482_s0 + $0x80] sm:$0xff]  ;;  %v1691_v39 = vld [vmem:[%s2482_s0 + $0x88] sm:$0xff] }
 0x3a9   :  { %v2208_v26 = vmul.f32 %v1690_v38, %v611_v2  ;;  %v2213_v51 = vmul.f32 %v1691_v39, %v611_v2  ;;  %v1697_v9 = vld [vmem:[%s2482_s0 + $0x48] sm:$0xff]  ;;  %v2305_v38 = vmul.f32 %v1699_v45, %v517_v0 }
 0x3aa   :  { %2500 = vst [vmem:[#allocation7_spill] sm:$0xff] %v2193_v36 }
 0x3ab   :  { %2501 = vst [vmem:[#allocation8_spill] sm:$0xff] %v2213_v51  ;;  %v657_v44 = vadd.f32 %v2190_v52, %v2208_v26  ;;  %v658_v46 = vadd.f32 %v2193_v36, %v2213_v51  ;;  %v665_v1 = vmax.f32 %v2208_v26, %v2190_v52  ;;  %v666_v2 = vmax.f32 %v2213_v51, %v2193_v36 }
 0x3ac   :  { %v522_v27 = vpop.permute.xlu1 %521 }
 0x3ad   :  { %v691_v5 = vadd.f32 %v659_v42, %v657_v44  ;;  %v700_v6 = vadd.f32 %v660_v30, %v658_v46  ;;  %v2278_v8 = vmul.f32 %v1696_v7, %v522_v27  ;;  %v2283_v10 = vmul.f32 %v1697_v9, %v522_v27  ;;  %v1700_v30 = vld [vmem:[%s2482_s0 + $0x60] sm:$0xff] }
 0x3af   :  { %v555_v40 = vadd.f32 %v2278_v8, %v2198_v24  ;;  %v556_v42 = vadd.f32 %v2283_v10, %v2203_v25  ;;  %v563_v0 = vmax.f32 %v2198_v24, %v2278_v8 }
 0x3b1   :  { %v635_v63 = vpop.permute.xlu1 %634 }
 0x3b2   :  { %v2270_v3 = vmul.f32 %v1858_v55, %v635_v63  ;;  %v2273_v4 = vmul.f32 %v1863_v56, %v635_v63 }
 0x3b4   :  { %2503 = vst [vmem:[#allocation10_spill] sm:$0xff] %v2273_v4  ;;  %v661_v55 = vadd.f32 %v2270_v3, %v2228_v35  ;;  %v662_v56 = vadd.f32 %v2273_v4, %v2233_v41  ;;  %v669_v12 = vmax.f32 %v2228_v35, %v2270_v3  ;;  %v670_v16 = vmax.f32 %v2233_v41, %v2273_v4 }
 0x3b6   :  { %v673_v39 = vmax.f32 %v665_v1, %v669_v12  ;;  %v682_v27 = vmax.f32 %v666_v2, %v670_v16  ;;  %v692_v28 = vadd.f32 %v691_v5, %v661_v55  ;;  %v701_v29 = vadd.f32 %v700_v6, %v662_v56  ;;  %v532_v34 = vpop.permute.xlu1 %531 }
 0x3b7   :  { %v2314_v31 = vmul.f32 %v1700_v30, %v532_v34  ;;  %v2319_v44 = vmul.f32 %v1701_v43, %v532_v34  ;;  %v564_v1 = vmax.f32 %v2203_v25, %v2283_v10 }
 0x3b8   :  { %v675_v46 = vmax.f32 %v673_v39, %v674_v59  ;;  %v684_v47 = vmax.f32 %v682_v27, %v683_v60  ;;  %v693_v49 = vadd.f32 %v692_v28, %v663_v57  ;;  %v702_v63 = vadd.f32 %v701_v29, %v664_v58  ;;  %v1703_v39 = vld [vmem:[%s2482_s0 + $0x78] sm:$0xff] }
 0x3b9   :  { %v559_v2 = vadd.f32 %v2314_v31, %v2250_v48  ;;  %v560_v5 = vadd.f32 %v2319_v44, %v2255_v50  ;;  %v589_v60 = vadd.f32 %v557_v61, %v555_v40  ;;  %v598_v57 = vadd.f32 %v558_v62, %v556_v42 }
 0x3ba   :  { %v676_v6 = vrot.slane %v675_v46, 4  ;;  %v685_v7 = vrot.slane %v684_v47, 4  ;;  %v694_v9 = vrot.slane %v693_v49, 4  ;;  %v703_v55 = vrot.slane %v702_v63, 4  ;;  %v537_v59 = vpop.permute.xlu1 %536 }
 0x3bb   :  { %v567_v58 = vmax.f32 %v2250_v48, %v2314_v31  ;;  %v568_v56 = vmax.f32 %v2255_v50, %v2319_v44  ;;  %v2336_v45 = vmul.f32 %v1702_v22, %v537_v59  ;;  %v2341_v61 = vmul.f32 %v1703_v39, %v537_v59 }
 0x3bc   :  { %v677_v12 = vmax.f32 %v675_v46, %v676_v6  ;;  %v695_v16 = vadd.f32 %v694_v9, %v693_v49  ;;  %v590_v62 = vadd.f32 %v589_v60, %v559_v2  ;;  %v599_v27 = vadd.f32 %v598_v57, %v560_v5 }
 0x3bd   :  { %v686_v28 = vmax.f32 %v684_v47, %v685_v7  ;;  %v704_v29 = vadd.f32 %v703_v55, %v702_v63  ;;  %v561_v42 = vadd.f32 %v2336_v45, %v2300_v37  ;;  %v562_v30 = vadd.f32 %v2341_v61, %v2305_v38 }
 0x3be   :  { %v678_v34 = vrot.slane %v677_v12, 2  ;;  %v696_v40 = vrot.slane %v695_v16, 2  ;;  %v569_v43 = vmax.f32 %v2300_v37, %v2336_v45  ;;  %v570_v46 = vmax.f32 %v2305_v38, %v2341_v61 }
 0x3bf   :  { %v687_v49 = vrot.slane %v686_v28, 2  ;;  %v705_v6 = vrot.slane %v704_v29, 2  ;;  %v571_v5 = vmax.f32 %v563_v0, %v567_v58  ;;  %v591_v47 = vadd.f32 %v590_v62, %v561_v42 }
 0x3c0   :  { %v697_v2 = vadd.f32 %v696_v40, %v695_v16  ;;  %v600_v63 = vadd.f32 %v599_v27, %v562_v30  ;;  %v580_v7 = vmax.f32 %v564_v1, %v568_v56  ;;  %v572_v9 = vmax.f32 %v565_v18, %v569_v43 }
 0x3c1   :  { %v581_v55 = vmax.f32 %v566_v54, %v570_v46  ;;  %v706_v59 = vadd.f32 %v705_v6, %v704_v29  ;;  %v592_v57 = vrot.slane %v591_v47, 4  ;;  %v679_v39 = vmax.f32 %v677_v12, %v678_v34 }
 0x3c2   :  { %v698_v60 = vrot.slane %v697_v2, 1  ;;  %v601_v22 = vrot.slane %v600_v63, 4  ;;  %v573_v15 = vmax.f32 %v571_v5, %v572_v9  ;;  %v688_v53 = vmax.f32 %v686_v28, %v687_v49 }
 0x3c3   :  { %v582_v4 = vmax.f32 %v580_v7, %v581_v55  ;;  %v707_v36 = vrot.slane %v706_v59, 1  ;;  %v593_v23 = vadd.f32 %v592_v57, %v591_v47  ;;  %v680_v56 = vrot.slane %v679_v39, 1 }
 0x3c4   :  { %v602_v41 = vadd.f32 %v601_v22, %v600_v63  ;;  %v574_v13 = vrot.slane %v573_v15, 4  ;;  %v699_v62 = vadd.f32 %v698_v60, %v697_v2  ;;  %v689_v54 = vrot.slane %v688_v53, 1 }
 0x3c5   :  { %v583_v51 = vrot.slane %v582_v4, 4  ;;  %v594_v16 = vrot.slane %v593_v23, 2  ;;  %v708_v58 = vadd.f32 %v707_v36, %v706_v59  ;;  %v681_v6 = vmax.f32 %v679_v39, %v680_v56 }
 0x3c6   :  { %v603_v0 = vrot.slane %v602_v41, 2  ;;  %v575_v1 = vmax.f32 %v573_v15, %v574_v13  ;;  %v709_v30 = vmul.f32 0.015625, %v699_v62  ;;  %v690_v49 = vmax.f32 %v688_v53, %v689_v54 }
 0x3c7   :  { %v584_v18 = vmax.f32 %v582_v4, %v583_v51  ;;  %v595_v27 = vadd.f32 %v594_v16, %v593_v23  ;;  %v710_v28 = vmul.f32 0.015625, %v708_v58  ;;  %v715_v7 = vrot.slane %v681_v6, 7 }
 0x3c8   :  { %v604_v29 = vadd.f32 %v603_v0, %v602_v41  ;;  %v576_v40 = vrot.slane %v575_v1, 2  ;;  %v717_v23 = vrot.slane %v709_v30, 7  ;;  %v716_v2 = vrot.slane %v690_v49, 7 }
 0x3c9   :  { %v585_v12 = vrot.slane %v584_v18, 2  ;;  %v596_v34 = vrot.slane %v595_v27, 1  ;;  %v718_v4 = vrot.slane %v710_v28, 7  ;;  %v797_v16 = vstv %s2486_s4 }
 0x3ca   :  { %v605_v42 = vrot.slane %v604_v29, 1  ;;  %v577_v43 = vmax.f32 %v575_v1, %v576_v40  ;;  %v1212_v49 = vlaneseq }
 0x3cb   :  { %v586_v46 = vmax.f32 %v584_v18, %v585_v12  ;;  %v597_v5 = vadd.f32 %v596_v34, %v595_v27 }
 0x3cc   :  { %v606_v47 = vadd.f32 %v605_v42, %v604_v29  ;;  %v578_v13 = vrot.slane %v577_v43, 1 }
 0x3cd   :  { %v587_v36 = vrot.slane %v586_v46, 1  ;;  %v607_v15 = vmul.f32 0.015625, %v597_v5  ;;  %v1213_v5 = vshrl.u32 %v1212_v49, 7 }
 0x3ce   :  { %v608_v51 = vmul.f32 0.015625, %v606_v47  ;;  %v579_v63 = vmax.f32 %v577_v43, %v578_v13 }
 0x3cf   :  { %v588_v41 = vmax.f32 %v586_v46, %v587_v36  ;;  %v726_v55 = vsel %vm723_vm7, %v607_v15, %v717_v23  ;;  %v1214_v47 = vsub.s32 0, %v1213_v5  ;;  %v1286_v36 = vsub.s32 1, %v1213_v5 }
 0x3d0   :  { %v727_v9 = vsel %vm723_vm7, %v608_v51, %v718_v4  ;;  %v724_v57 = vsel %vm723_vm7, %v579_v63, %v715_v7  ;;  %v730_v53 = vpack.c.bf16 %v726_v55, %v726_v55 }
 0x3d1   :  { %v725_v59 = vsel %vm723_vm7, %v588_v41, %v716_v2  ;;  %v731_v60 = vpack.c.bf16 %v727_v9, %v727_v9  ;;  %v728_v39 = vpack.c.bf16 %v724_v57, %v724_v57 }
 0x3d2   :  { %v729_v22 = vpack.c.bf16 %v725_v59, %v725_v59 }
 0x3d3   :  { %1191 = vmatprep.mubr.bf16.mxu1 %v731_v60 }
 0x3d4   :  { %1150 = vmatprep.mubr.bf16.mxu0 %v729_v22  ;;  %1192 = vmatmul.mubr.bf16.vlgmr.msra.gmra.mrb[8].mxu1 %v730_v53  ;;  %v2508_v53 = vld [vmem:[#allocation7_spill] sm:$0xff] }
 0x3d5   :  { %1151 = vmatmul.mubr.bf16.vlgmr.msra.gmra.mrb[4].mxu0 %v728_v39  ;;  %v2509_v39 = vld [vmem:[#allocation5_spill] sm:$0xff] }
 0x4a7   :  { %v1193_v0 = vpop.f32.mrb[8].mxu1 }
 0x4a8   :  { %v1152_v58 = vpop.f32.mrb[4].mxu0  ;;  %v1195_v62 = vpop.f32.mrb[9].mxu1 }
 0x4a9   :  { %v1153_v1 = vadd.f32 %v1152_v58, %v797_v16  ;;  %v1154_v18 = vpop.f32.mrb[5].mxu0  ;;  %v1197_v54 = vpop.f32.mrb[10].mxu1 }
 0x4aa   :  { %v1155_v56 = vadd.f32 %v1154_v18, %v797_v16  ;;  %v1156_v27 = vpop.f32.mrb[6].mxu0  ;;  %v1198_v29 = vpop.f32.mrb[11].mxu1 }
 0x4ab   :  { %v1194_v40 = vadd.f32 %v1193_v0, %v1153_v1  ;;  %v1157_v12 = vpop.f32.mrb[7].mxu0  ;;  %v2510_v0 = vld [vmem:[#allocation10_spill] sm:$0xff] }
 0x4ac   :  { %v1196_v34 = vadd.f32 %v1195_v62, %v1155_v56  ;;  %v2511_v62 = vld [vmem:[#allocation4_spill] sm:$0xff] }
 0x4ad   :  { %v1427_v42 = vmul.f32 -1.442695, %v1194_v40 }
 0x4ae   :  { %v1428_v28 = vmul.f32 -1.442695, %v1196_v34 }
 0x4af   :  { %1674 = vpow2.f32 %v1427_v42 }
 0x4b0   :  { %1676 = vpow2.f32 %v1428_v28 }
 0x4b9   :  { %v1675_v30 = vpop.eup %1674 }
 0x4ba   :  { %v1677_v43 = vpop.eup %1676  ;;  %v1206_v46 = vadd.f32 1.0, %v1675_v30 }
 0x4bb   :  { %v1207_v6 = vadd.f32 1.0, %v1677_v43 }
 0x4bc   :  { %1678 = vrcp.f32 %v1206_v46 }
 0x4bd   :  { %1680 = vrcp.f32 %v1207_v6 }
 0x4c6   :  { %v1679_v13 = vpop.eup %1678 }
 0x4c7   :  { %v1681_v15 = vpop.eup %1680  ;;  %v1215_v51 = vrot.slane %v1679_v13, %v1214_v47  ;;  %v1287_v4 = vrot.slane %v1679_v13, %v1286_v36 }
 0x4c8   :  { %v1219_v23 = vrot.slane %v1681_v15, %v1214_v47  ;;  %v1291_v41 = vrot.slane %v1681_v15, %v1286_v36 }
 0x4c9   :  { %v1220_v2 = vmul.f32 %v1215_v51, %v2198_v24  ;;  %v1222_v63 = vmul.f32 %v1215_v51, %v2166_v17  ;;  %v1224_v7 = vmul.f32 %v1215_v51, %v2250_v48  ;;  %v1226_v9 = vmul.f32 %v1215_v51, %v2300_v37  ;;  %v2505_v37 = vld [vmem:[#allocation3_spill] sm:$0xff] }
 0x4ca   :  { %v1228_v55 = vmul.f32 %v1215_v51, %v2278_v8  ;;  %v1230_v59 = vmul.f32 %v1215_v51, %v2220_v32  ;;  %v1232_v60 = vmul.f32 %v1215_v51, %v2314_v31  ;;  %v1234_v57 = vmul.f32 %v1215_v51, %v2336_v45  ;;  %v2506_v31 = vld [vmem:[#allocation9_spill] sm:$0xff]  ;;  %v2507_v45 = vld [vmem:[#allocation6_spill] sm:$0xff] }
 0x4cb   :  { %1236 = vst [vmem:[%s2487_s5] sm:$0xff] %v1220_v2  ;;  %1238 = vst [vmem:[%s2487_s5 + $0x10] sm:$0xff] %v1222_v63  ;;  %v1292_v17 = vmul.f32 %v1287_v4, %v2208_v26  ;;  %v1294_v24 = vmul.f32 %v1287_v4, %v2150_v11  ;;  %v1296_v32 = vmul.f32 %v1287_v4, %v2228_v35 }
 0x4cc   :  { %1240 = vst [vmem:[%s2487_s5 + $0x20] sm:$0xff] %v1224_v7  ;;  %1242 = vst [vmem:[%s2487_s5 + $0x30] sm:$0xff] %v1226_v9  ;;  %v1298_v48 = vmul.f32 %v1287_v4, %v2182_v21  ;;  %v1300_v11 = vmul.f32 %v1287_v4, %v2190_v52  ;;  %v1302_v21 = vmul.f32 %v1287_v4, %v2174_v20 }
 0x4cd   :  { %1244 = vst [vmem:[%s2487_s5 + $0x40] sm:$0xff] %v1228_v55  ;;  %1246 = vst [vmem:[%s2487_s5 + $0x50] sm:$0xff] %v1230_v59  ;;  %v1304_v26 = vmul.f32 %v1287_v4, %v2270_v3  ;;  %v1306_v35 = vmul.f32 %v1287_v4, %v2158_v14  ;;  %v1221_v20 = vmul.f32 %v1219_v23, %v2203_v25 }
 0x4ce   :  { %1248 = vst [vmem:[%s2487_s5 + $0x60] sm:$0xff] %v1232_v60  ;;  %1250 = vst [vmem:[%s2487_s5 + $0x70] sm:$0xff] %v1234_v57  ;;  %v1223_v14 = vmul.f32 %v1219_v23, %v2171_v19  ;;  %v1225_v52 = vmul.f32 %v1219_v23, %v2255_v50  ;;  %v1227_v3 = vmul.f32 %v1219_v23, %v2305_v38 }
 0x4cf   :  { %1445 = vst [vmem:[%s2487_s5 + $0x80] sm:$0xff] %v1292_v17  ;;  %1447 = vst [vmem:[%s2487_s5 + $0x90] sm:$0xff] %v1294_v24  ;;  %v1229_v19 = vmul.f32 %v1219_v23, %v2283_v10  ;;  %v1231_v25 = vmul.f32 %v1219_v23, %v2223_v33  ;;  %v1233_v50 = vmul.f32 %v1219_v23, %v2319_v44  ;;  %v2504_v33 = vld [vmem:[#allocation8_spill] sm:$0xff] }
 0x4d0   :  { %1449 = vst [vmem:[%s2487_s5 + $0xa0] sm:$0xff] %v1296_v32  ;;  %1451 = vst [vmem:[%s2487_s5 + $0xb0] sm:$0xff] %v1298_v48  ;;  %v1235_v8 = vmul.f32 %v1219_v23, %v2341_v61  ;;  %v1293_v10 = vmul.f32 %v1291_v41, %v2504_v33  ;;  %v1295_v38 = vmul.f32 %v1291_v41, %v2505_v37 }
 0x4d1   :  { %1453 = vst [vmem:[%s2487_s5 + $0xc0] sm:$0xff] %v1300_v11  ;;  %1455 = vst [vmem:[%s2487_s5 + $0xd0] sm:$0xff] %v1302_v21  ;;  %v1297_v44 = vmul.f32 %v1291_v41, %v2506_v31  ;;  %v1299_v61 = vmul.f32 %v1291_v41, %v2507_v45  ;;  %v1301_v22 = vmul.f32 %v1291_v41, %v2508_v53 }
 0x4d2   :  { %1457 = vst [vmem:[%s2487_s5 + $0xe0] sm:$0xff] %v1304_v26  ;;  %1459 = vst [vmem:[%s2487_s5 + $0xf0] sm:$0xff] %v1306_v35  ;;  %v1303_v16 = vmul.f32 %v1291_v41, %v2509_v39  ;;  %v1305_v58 = vmul.f32 %v1291_v41, %v2510_v0  ;;  %v1307_v1 = vmul.f32 %v1291_v41, %v2511_v62 }
 0x4d3   :  { %1237 = vst [vmem:[%s2487_s5 + $0x8] sm:$0xff] %v1221_v20  ;;  %1239 = vst [vmem:[%s2487_s5 + $0x18] sm:$0xff] %v1223_v14 }
 0x4d4   :  { %1241 = vst [vmem:[%s2487_s5 + $0x28] sm:$0xff] %v1225_v52  ;;  %1243 = vst [vmem:[%s2487_s5 + $0x38] sm:$0xff] %v1227_v3 }
 0x4d5   :  { %1245 = vst [vmem:[%s2487_s5 + $0x48] sm:$0xff] %v1229_v19  ;;  %1247 = vst [vmem:[%s2487_s5 + $0x58] sm:$0xff] %v1231_v25 }
 0x4d6   :  { %1249 = vst [vmem:[%s2487_s5 + $0x68] sm:$0xff] %v1233_v50  ;;  %1251 = vst [vmem:[%s2487_s5 + $0x78] sm:$0xff] %v1235_v8 }
 0x4d7   :  { %1446 = vst [vmem:[%s2487_s5 + $0x88] sm:$0xff] %v1293_v10  ;;  %1448 = vst [vmem:[%s2487_s5 + $0x98] sm:$0xff] %v1295_v38 }
 0x4d8   :  { %1450 = vst [vmem:[%s2487_s5 + $0xa8] sm:$0xff] %v1297_v44  ;;  %1452 = vst [vmem:[%s2487_s5 + $0xb8] sm:$0xff] %v1299_v61 }
 0x4d9   :  { %1454 = vst [vmem:[%s2487_s5 + $0xc8] sm:$0xff] %v1301_v22  ;;  %1456 = vst [vmem:[%s2487_s5 + $0xd8] sm:$0xff] %v1303_v16 }
 0x4da   :  { %1458 = vst [vmem:[%s2487_s5 + $0xe8] sm:$0xff] %v1305_v58  ;;  %1460 = vst [vmem:[%s2487_s5 + $0xf8] sm:$0xff] %v1307_v1 }

</bundles_post_ra>
